<compile_context>
chip_gen: v7x
topology: tpu7x:2x2x1
jax: 0.10.0
libtpu: 0.0.40
codegen_flags: <defaults>
</compile_context>

<pallas_src>
import functools

import jax
import jax.numpy as jnp
from jax import lax
from jax.experimental import pallas as pl
from jax.experimental.pallas import tpu as pltpu


# ----------------------------------------------------------------------------
# Pallas kernel: one grid step == one image (NHWC).
# ----------------------------------------------------------------------------
def _residual_kernel(x_ref, w1_ref, b1_ref, w2_ref, b2_ref, w3_ref, b3_ref,
                     out_ref, col_ref, *, use_proj, hh, ww, th):
    cin = x_ref.shape[-1]
    ch = w1_ref.shape[-1]
    cout = w3_ref.shape[-1]
    m = hh * ww
    tm = th * ww                     # rows per M-tile
    n_tiles = hh // th
    cdt = w1_ref.dtype               # MXU compute dtype (bf16)

    # ---- conv1 (1x1, BN scale pre-folded) + bias + ReLU; stage in bf16 ------
    xf = x_ref[0].reshape(m, cin)                                   # bf16
    h1 = jnp.dot(xf, w1_ref[...], preferred_element_type=jnp.float32)
    h1 = jnp.maximum(h1 + b1_ref[...], 0.0).astype(cdt)             # (m, ch)

    # ---- im2col along dx (zero-padded neighbour slices), stays in bf16 ------
    h3 = h1.reshape(hh, ww, ch)
    zc = jnp.zeros((hh, 1, ch), cdt)
    left = jnp.concatenate([zc, h3[:, :ww - 1, :]], axis=1)     # h1[., x-1]
    right = jnp.concatenate([h3[:, 1:, :], zc], axis=1)         # h1[., x+1]
    colv = jnp.concatenate([left, h3, right], axis=-1)          # (hh, ww, 3ch)

    # Flat, row-padded col buffer: flat row p*ww + x  <->  padded image row p;
    # padded row 0 and hh+1 are the zero halos.  Output row q = y*ww + x reads
    # col rows q + dy*ww for dy in {0,1,2}.
    col_ref[pl.ds(ww, m), :] = colv.reshape(m, 3 * ch)
    zrow = jnp.zeros((ww, 3 * ch), cdt)
    col_ref[pl.ds(0, ww), :] = zrow                       # y = -1 halo
    col_ref[pl.ds((hh + 1) * ww, ww), :] = zrow           # y = hh halo
    # (halos re-written every step: scratch is per-core under megacore)

    # ---- conv2 (3x3) + bias + ReLU, fused conv3 [+ projection], per M-tile --
    def tile_body(t, carry):
        q0 = t * tm
        # register-resident 3-tap accumulation (no VMEM RMW accumulator)
        acc = jnp.dot(col_ref[pl.ds(q0, tm), :], w2_ref[0],
                      preferred_element_type=jnp.float32)
        acc = acc + jnp.dot(col_ref[pl.ds(q0 + ww, tm), :], w2_ref[1],
                            preferred_element_type=jnp.float32)
        acc = acc + jnp.dot(col_ref[pl.ds(q0 + 2 * ww, tm), :], w2_ref[2],
                            preferred_element_type=jnp.float32)
        h2 = jnp.maximum(acc + b2_ref[...], 0.0).astype(cdt)       # (tm, ch)

        y0 = t * th
        xt = x_ref[0, pl.ds(y0, th)].reshape(tm, cin)               # bf16
        if use_proj:
            # conv3 + residual projection fused into one matmul (K = ch + cin)
            rhs = jnp.concatenate([h2, xt], axis=-1)
            out = jnp.dot(rhs, w3_ref[...],
                          preferred_element_type=jnp.float32) + b3_ref[...]
        else:
            out = jnp.dot(h2, w3_ref[...],
                          preferred_element_type=jnp.float32) + b3_ref[...]
            out = out + xt.astype(jnp.float32)                      # identity skip
        out_ref[0, pl.ds(y0, th)] = out.reshape(th, ww, cout).astype(out_ref.dtype)
        return carry

    lax.fori_loop(0, n_tiles, tile_body, 0, unroll=n_tiles <= 8)


# ----------------------------------------------------------------------------
# Parameter folding: BN scale -> conv weights; conv2 taps regrouped (3, 3ch, ch);
# conv3 and the residual projection fused along K; biases pre-summed.
# ----------------------------------------------------------------------------
def fold_params(params, compute_dtype=jnp.bfloat16):
    ch = params["w1"].shape[-1]
    cout = params["w3"].shape[-1]
    f = {}
    f["w1"] = (params["w1"] * params["s1"].reshape(1, ch)).astype(compute_dtype)
    f["b1"] = params["b1"].reshape(1, ch).astype(jnp.float32)
    w2 = params["w2"].reshape(3, 3, ch, ch) * params["s2"].reshape(1, 1, 1, ch)
    f["w2"] = w2.reshape(3, 3 * ch, ch).astype(compute_dtype)   # [dy, dx*ch+i, o]
    f["b2"] = params["b2"].reshape(1, ch).astype(jnp.float32)

    w3 = params["w3"] * params["s3"].reshape(1, cout)
    b3 = params["b3"].reshape(1, cout).astype(jnp.float32)
    if "w_res" in params:
        wr = params["w_res"] * params["s_res"].reshape(1, cout)
        w3 = jnp.concatenate([w3, wr], axis=0)                  # (ch + cin, cout)
        b3 = b3 + params["b_res"].reshape(1, cout).astype(jnp.float32)
        f["use_proj"] = True
    else:
        f["use_proj"] = False
    f["w3"] = w3.astype(compute_dtype)
    f["b3"] = b3
    return f


# ----------------------------------------------------------------------------
# Wrapper — NHWC is the hot path (no layout transposes around the kernel)
# ----------------------------------------------------------------------------
def residual_forward_nhwc(x_nhwc, folded, *, stride=1, rows_per_tile=256,
                          compute_dtype=jnp.bfloat16, out_dtype=jnp.bfloat16):
    assert stride == 1, "only stride=1 supported"  # TODO(synk): strided conv2
    N, H, W, Cin = x_nhwc.shape
    assert W % 8 == 0, "W must be a multiple of 8 (16 preferred for bf16 packing)"
    use_proj = bool(folded["use_proj"])
    ch = folded["w1"].shape[-1]
    Cout = folded["w3"].shape[-1]

    # M-tile height: th rows of the image per inner tile, tm = th*W ~ 256 rows.
    th = max(1, min(H, rows_per_tile // max(W, 1)))
    while H % th:
        th -= 1

    x_c = x_nhwc.astype(compute_dtype)      # bf16 activations -> half the DMA

    inputs = [x_c, folded["w1"], folded["b1"], folded["w2"], folded["b2"],
              folded["w3"], folded["b3"]]

    def const_spec(a):
        nd = a.ndim
        return pl.BlockSpec(a.shape, lambda n, _nd=nd: (0,) * _nd)

    in_specs = [pl.BlockSpec((1, H, W, Cin), lambda n: (n, 0, 0, 0))]
    in_specs += [const_spec(a) for a in inputs[1:]]
    out_spec = pl.BlockSpec((1, H, W, Cout), lambda n: (n, 0, 0, 0))

    kernel = functools.partial(_residual_kernel, use_proj=use_proj,
                               hh=H, ww=W, th=th)

    scratch = [pltpu.VMEM(((H + 2) * W, 3 * ch), compute_dtype)]   # flat im2col

    # Advisory cost so XLA can schedule surrounding ops around the custom call.
    k3 = ch + (Cin if use_proj else 0)
    flops = 2 * N * H * W * (Cin * ch + 9 * ch * ch + k3 * Cout)
    param_bytes = sum(int(a.size) * a.dtype.itemsize for a in inputs[1:])
    bytes_acc = (N * H * W * Cin * jnp.dtype(compute_dtype).itemsize
                 + N * H * W * Cout * jnp.dtype(out_dtype).itemsize
                 + param_bytes)
    cost = pl.CostEstimate(flops=int(flops), transcendentals=0,
                           bytes_accessed=int(bytes_acc))

    # Real VMEM accounting: double-buffered x/out blocks, 2x params (default
    # pipelining), col scratch, plus Mosaic-internal headroom.  Cap
    # generation-aware (128 MiB parts may exceed 64 MiB; v7x has only 64 MiB).
    block_in = H * W * Cin * jnp.dtype(compute_dtype).itemsize
    block_out = H * W * Cout * jnp.dtype(out_dtype).itemsize
    col_bytes = (H + 2) * W * 3 * ch * jnp.dtype(compute_dtype).itemsize
    need = 2 * (block_in + block_out) + 2 * param_bytes + col_bytes + (8 << 20)
    try:
        phys_vmem = int(pltpu.get_tpu_info().vmem_capacity_bytes)
    except Exception:
        phys_vmem = 128 << 20
    cap = max(32 << 20, phys_vmem - (16 << 20))
    vmem_limit = int(min(cap, max(32 << 20, need)))

    return pl.pallas_call(
        kernel,
        out_shape=jax.ShapeDtypeStruct((N, H, W, Cout), out_dtype),
        grid_spec=pltpu.PrefetchScalarGridSpec(
            num_scalar_prefetch=0,
            grid=(N,),
            in_specs=in_specs,
            out_specs=out_spec,
            scratch_shapes=scratch),
        compiler_params=pltpu.CompilerParams(
            dimension_semantics=("parallel",),
            vmem_limit_bytes=vmem_limit),
        cost_estimate=cost,
    )(*inputs)


def residual_forward_nchw(x_nchw, folded, **kw):
    """Drop-in NCHW wrapper (layout plumbing kept out of the hot path)."""
    y = residual_forward_nhwc(jnp.transpose(x_nchw, (0, 2, 3, 1)), folded, **kw)
    return jnp.transpose(y, (0, 3, 1, 2))


# ----------------------------------------------------------------------------
# Deterministic parameter construction (BN folded into scale/bias, eps=1e-5)
# ----------------------------------------------------------------------------
def make_params(key, inplanes, planes):
    ch = planes // 2
    eps = 1e-5
    ks = jax.random.split(key, 16)

    def bn_fold(kg, kb, km, kv, c):
        gamma = 1.0 + 0.1 * jax.random.normal(kg, (c,), jnp.float32)
        beta = 0.1 * jax.random.normal(kb, (c,), jnp.float32)
        mean = 0.1 * jax.random.normal(km, (c,), jnp.float32)
        var = 0.5 + 0.1 * jnp.abs(jax.random.normal(kv, (c,), jnp.float32))
        scale = gamma / jnp.sqrt(var + eps)
        bias = beta - mean * scale
        return scale.reshape(1, c), bias.reshape(1, c)

    p = {}
    p["w1"] = 0.1 * jax.random.normal(ks[0], (inplanes, ch), jnp.float32)
    p["s1"], p["b1"] = bn_fold(ks[1], ks[2], ks[3], ks[4], ch)
    w2_hwio = 0.1 * jax.random.normal(ks[5], (3, 3, ch, ch), jnp.float32)
    p["w2_hwio"] = w2_hwio
    p["w2"] = w2_hwio.reshape(9, ch, ch)
    p["s2"], p["b2"] = bn_fold(ks[6], ks[7], ks[8], ks[9], ch)
    p["w3"] = 0.1 * jax.random.normal(ks[10], (ch, planes), jnp.float32)
    p["s3"], p["b3"] = bn_fold(ks[11], ks[12], ks[13], ks[14], planes)
    if inplanes != planes:
        kr = jax.random.split(ks[15], 5)
        p["w_res"] = 0.1 * jax.random.normal(kr[0], (inplanes, planes), jnp.float32)
        p["s_res"], p["b_res"] = bn_fold(kr[1], kr[2], kr[3], kr[4], planes)
    return p


# ----------------------------------------------------------------------------
# Pure-JAX reference (NHWC convs) for correctness check
# ----------------------------------------------------------------------------
def reference_forward_nhwc(x, params):
    dn = ("NHWC", "HWIO", "NHWC")
    hp = lax.Precision.HIGHEST

    def conv(y, w, pad):
        return lax.conv_general_dilated(y, w, (1, 1), pad,
                                        dimension_numbers=dn, precision=hp)

    def bn(y, s, b):
        return y * s.reshape(1, 1, 1, -1) + b.reshape(1, 1, 1, -1)

    h = jnp.maximum(bn(conv(x, params["w1"][None, None], "VALID"),
                       params["s1"], params["b1"]), 0.0)
    h = jnp.maximum(bn(conv(h, params["w2_hwio"], "SAME"),
                       params["s2"], params["b2"]), 0.0)
    out = bn(conv(h, params["w3"][None, None], "VALID"),
             params["s3"], params["b3"])
    if "w_res" in params:
        res = bn(conv(x, params["w_res"][None, None], "VALID"),
                 params["s_res"], params["b_res"])
    else:
        res = x
    return out + res


if __name__ == "__main__":
    key = jax.random.PRNGKey(0)
    k_x, k_p = jax.random.split(key)

    N, Cin, H, W = 2, 4, 16, 16
    planes = 8                      # inplanes != planes -> projection branch used

    x_nhwc = jax.random.normal(k_x, (N, H, W, Cin), jnp.float32)
    params = make_params(k_p, Cin, planes)
    folded = fold_params(params)    # BN folded into conv weights, bf16 MXU inputs

    out = residual_forward_nhwc(x_nhwc, folded)
    out = jax.block_until_ready(out)

    ref = reference_forward_nhwc(x_nhwc, params)
    assert out.shape == (N, H, W, planes)
    assert out.dtype == jnp.bfloat16
    # Tolerance sized for bf16 weights / activation staging / bf16 output
    # (f32 MXU accumulation and f32 bias/ReLU/add epilogue).
    assert jnp.allclose(out.astype(jnp.float32), ref, rtol=3e-2, atol=3e-2), \
        "mismatch vs reference"

    print("KERNEL_OK")
</pallas_src>

<mosaic_0001>
module attributes {stable_mosaic.version = 11 : i64} {
  func.func @_residual_kernel(%arg0: i32, %arg1: memref<1x16x16x4xbf16, #tpu.memory_space<vmem>>, %arg2: memref<4x4xbf16, #tpu.memory_space<vmem>>, %arg3: memref<1x4xf32, #tpu.memory_space<vmem>>, %arg4: memref<3x12x4xbf16, #tpu.memory_space<vmem>>, %arg5: memref<1x4xf32, #tpu.memory_space<vmem>>, %arg6: memref<8x8xbf16, #tpu.memory_space<vmem>>, %arg7: memref<1x8xf32, #tpu.memory_space<vmem>>, %arg8: memref<1x16x16x8xbf16, #tpu.memory_space<vmem>>, %arg9: memref<288x12xbf16, #tpu.memory_space<vmem>>) attributes {dimension_semantics = [#tpu.dimension_semantics<parallel>], iteration_bounds = array<i64: 2>, scalar_prefetch = 0 : i64, scratch_operands = 1 : i64, tpu.core_type = #tpu.core_type<tc>, window_params = [{transform_indices = @transform_0, window_bounds = array<i64: 1, 16, 16, 4>}, {pipeline_mode = #tpu.pipeline_mode<synchronous>, transform_indices = @transform_1, window_bounds = array<i64: 4, 4>}, {pipeline_mode = #tpu.pipeline_mode<synchronous>, transform_indices = @transform_2, window_bounds = array<i64: 1, 4>}, {pipeline_mode = #tpu.pipeline_mode<synchronous>, transform_indices = @transform_3, window_bounds = array<i64: 3, 12, 4>}, {pipeline_mode = #tpu.pipeline_mode<synchronous>, transform_indices = @transform_4, window_bounds = array<i64: 1, 4>}, {pipeline_mode = #tpu.pipeline_mode<synchronous>, transform_indices = @transform_5, window_bounds = array<i64: 8, 8>}, {pipeline_mode = #tpu.pipeline_mode<synchronous>, transform_indices = @transform_6, window_bounds = array<i64: 1, 8>}, {transform_indices = @transform_7, window_bounds = array<i64: 1, 16, 16, 8>}]} {
    %c0 = arith.constant 0 : index
    %c0_0 = arith.constant 0 : index
    %c0_1 = arith.constant 0 : index
    %c0_2 = arith.constant 0 : index
    %0 = vector.load %arg1[%c0, %c0_0, %c0_1, %c0_2] : memref<1x16x16x4xbf16, #tpu.memory_space<vmem>>, vector<1x16x16x4xbf16>
    %1 = vector.shape_cast %0 : vector<1x16x16x4xbf16> to vector<16x16x4xbf16>
    %2 = vector.shape_cast %1 : vector<16x16x4xbf16> to vector<256x4xbf16>
    %c0_3 = arith.constant 0 : index
    %c0_4 = arith.constant 0 : index
    %3 = vector.load %arg2[%c0_3, %c0_4] : memref<4x4xbf16, #tpu.memory_space<vmem>>, vector<4x4xbf16>
    %cst = arith.constant dense<0.000000e+00> : vector<256x4xf32>
    %4 = tpu.matmul %2, %3, %cst {dimension_numbers = #tpu.dot_dimension_numbers<[1], [0], [0], [1], [0, 0, 1, 1], [], []>} : vector<256x4xbf16>, vector<4x4xbf16>, vector<256x4xf32> -> vector<256x4xf32>
    %c0_5 = arith.constant 0 : index
    %c0_6 = arith.constant 0 : index
    %5 = vector.load %arg3[%c0_5, %c0_6] : memref<1x4xf32, #tpu.memory_space<vmem>>, vector<1x4xf32>
    %6 = vector.broadcast %5 : vector<1x4xf32> to vector<256x4xf32>
    %7 = arith.addf %4, %6 : vector<256x4xf32>
    %cst_7 = arith.constant 0.000000e+00 : f32
    %8 = vector.broadcast %cst_7 : f32 to vector<256x4xf32>
    %9 = arith.maximumf %7, %8 : vector<256x4xf32>
    %10 = arith.truncf %9 : vector<256x4xf32> to vector<256x4xbf16>
    %11 = vector.shape_cast %10 : vector<256x4xbf16> to vector<16x16x4xbf16>
    %cst_8 = arith.constant 0.000000e+00 : bf16
    %12 = vector.broadcast %cst_8 : bf16 to vector<16x1x4xbf16>
    %13 = vector.extract_strided_slice %11 {offsets = [0, 0, 0], sizes = [16, 15, 4], strides = [1, 1, 1]} : vector<16x16x4xbf16> to vector<16x15x4xbf16>
    %14 = tpu.concatenate %12, %13 in 1 : vector<16x1x4xbf16>, vector<16x15x4xbf16> -> vector<16x16x4xbf16>
    %15 = vector.extract_strided_slice %11 {offsets = [0, 1, 0], sizes = [16, 15, 4], strides = [1, 1, 1]} : vector<16x16x4xbf16> to vector<16x15x4xbf16>
    %16 = tpu.concatenate %15, %12 in 1 : vector<16x15x4xbf16>, vector<16x1x4xbf16> -> vector<16x16x4xbf16>
    %17 = tpu.concatenate %14, %11, %16 in 2 : vector<16x16x4xbf16>, vector<16x16x4xbf16>, vector<16x16x4xbf16> -> vector<16x16x12xbf16>
    %18 = vector.shape_cast %17 : vector<16x16x12xbf16> to vector<256x12xbf16>
    %c16 = arith.constant 16 : index
    %c0_9 = arith.constant 0 : index
    %19 = vector.load %arg9[%c16, %c0_9] : memref<288x12xbf16, #tpu.memory_space<vmem>>, vector<256x12xbf16>
    tpu.vector_store %arg9[%c16, %c0_9], %18 {strides = array<i32>} : memref<288x12xbf16, #tpu.memory_space<vmem>>, vector<256x12xbf16>,
    %cst_10 = arith.constant 0.000000e+00 : bf16
    %20 = vector.broadcast %cst_10 : bf16 to vector<16x12xbf16>
    %c0_11 = arith.constant 0 : index
    %c0_12 = arith.constant 0 : index
    %21 = vector.load %arg9[%c0_11, %c0_12] : memref<288x12xbf16, #tpu.memory_space<vmem>>, vector<16x12xbf16>
    tpu.vector_store %arg9[%c0_11, %c0_12], %20 {strides = array<i32>} : memref<288x12xbf16, #tpu.memory_space<vmem>>, vector<16x12xbf16>,
    %c272 = arith.constant 272 : index
    %c0_13 = arith.constant 0 : index
    %22 = vector.load %arg9[%c272, %c0_13] : memref<288x12xbf16, #tpu.memory_space<vmem>>, vector<16x12xbf16>
    tpu.vector_store %arg9[%c272, %c0_13], %20 {strides = array<i32>} : memref<288x12xbf16, #tpu.memory_space<vmem>>, vector<16x12xbf16>,
    %c0_i32 = arith.constant 0 : i32
    %c256_i32 = arith.constant 256 : i32
    %23 = arith.muli %c0_i32, %c256_i32 : i32
    %24 = arith.index_cast %23 : i32 to index
    %c0_14 = arith.constant 0 : index
    %25 = vector.load %arg9[%24, %c0_14] : memref<288x12xbf16, #tpu.memory_space<vmem>>, vector<256x12xbf16>
    %c0_15 = arith.constant 0 : index
    %c0_16 = arith.constant 0 : index
    %c0_17 = arith.constant 0 : index
    %26 = vector.load %arg4[%c0_15, %c0_16, %c0_17] : memref<3x12x4xbf16, #tpu.memory_space<vmem>>, vector<1x12x4xbf16>
    %27 = vector.shape_cast %26 : vector<1x12x4xbf16> to vector<12x4xbf16>
    %cst_18 = arith.constant dense<0.000000e+00> : vector<256x4xf32>
    %28 = tpu.matmul %25, %27, %cst_18 {dimension_numbers = #tpu.dot_dimension_numbers<[1], [0], [0], [1], [0, 0, 1, 1], [], []>} : vector<256x12xbf16>, vector<12x4xbf16>, vector<256x4xf32> -> vector<256x4xf32>
    %c16_i32 = arith.constant 16 : i32
    %29 = arith.addi %23, %c16_i32 : i32
    %30 = arith.index_cast %29 : i32 to index
    %c0_19 = arith.constant 0 : index
    %31 = vector.load %arg9[%30, %c0_19] : memref<288x12xbf16, #tpu.memory_space<vmem>>, vector<256x12xbf16>
    %c1 = arith.constant 1 : index
    %c0_20 = arith.constant 0 : index
    %c0_21 = arith.constant 0 : index
    %32 = vector.load %arg4[%c1, %c0_20, %c0_21] : memref<3x12x4xbf16, #tpu.memory_space<vmem>>, vector<1x12x4xbf16>
    %33 = vector.shape_cast %32 : vector<1x12x4xbf16> to vector<12x4xbf16>
    %cst_22 = arith.constant dense<0.000000e+00> : vector<256x4xf32>
    %34 = tpu.matmul %31, %33, %cst_22 {dimension_numbers = #tpu.dot_dimension_numbers<[1], [0], [0], [1], [0, 0, 1, 1], [], []>} : vector<256x12xbf16>, vector<12x4xbf16>, vector<256x4xf32> -> vector<256x4xf32>
    %35 = arith.addf %28, %34 : vector<256x4xf32>
    %c32_i32 = arith.constant 32 : i32
    %36 = arith.addi %23, %c32_i32 : i32
    %37 = arith.index_cast %36 : i32 to index
    %c0_23 = arith.constant 0 : index
    %38 = vector.load %arg9[%37, %c0_23] : memref<288x12xbf16, #tpu.memory_space<vmem>>, vector<256x12xbf16>
    %c2 = arith.constant 2 : index
    %c0_24 = arith.constant 0 : index
    %c0_25 = arith.constant 0 : index
    %39 = vector.load %arg4[%c2, %c0_24, %c0_25] : memref<3x12x4xbf16, #tpu.memory_space<vmem>>, vector<1x12x4xbf16>
    %40 = vector.shape_cast %39 : vector<1x12x4xbf16> to vector<12x4xbf16>
    %cst_26 = arith.constant dense<0.000000e+00> : vector<256x4xf32>
    %41 = tpu.matmul %38, %40, %cst_26 {dimension_numbers = #tpu.dot_dimension_numbers<[1], [0], [0], [1], [0, 0, 1, 1], [], []>} : vector<256x12xbf16>, vector<12x4xbf16>, vector<256x4xf32> -> vector<256x4xf32>
    %42 = arith.addf %35, %41 : vector<256x4xf32>
    %c0_27 = arith.constant 0 : index
    %c0_28 = arith.constant 0 : index
    %43 = vector.load %arg5[%c0_27, %c0_28] : memref<1x4xf32, #tpu.memory_space<vmem>>, vector<1x4xf32>
    %44 = vector.broadcast %43 : vector<1x4xf32> to vector<256x4xf32>
    %45 = arith.addf %42, %44 : vector<256x4xf32>
    %cst_29 = arith.constant 0.000000e+00 : f32
    %46 = vector.broadcast %cst_29 : f32 to vector<256x4xf32>
    %47 = arith.maximumf %45, %46 : vector<256x4xf32>
    %48 = arith.truncf %47 : vector<256x4xf32> to vector<256x4xbf16>
    %c16_i32_30 = arith.constant 16 : i32
    %49 = arith.muli %c0_i32, %c16_i32_30 : i32
    %c0_31 = arith.constant 0 : index
    %50 = arith.index_cast %49 : i32 to index
    %c0_32 = arith.constant 0 : index
    %c0_33 = arith.constant 0 : index
    %51 = vector.load %arg1[%c0_31, %50, %c0_32, %c0_33] : memref<1x16x16x4xbf16, #tpu.memory_space<vmem>>, vector<1x16x16x4xbf16>
    %52 = vector.shape_cast %51 : vector<1x16x16x4xbf16> to vector<16x16x4xbf16>
    %53 = vector.shape_cast %52 : vector<16x16x4xbf16> to vector<256x4xbf16>
    %54 = tpu.concatenate %48, %53 in 1 : vector<256x4xbf16>, vector<256x4xbf16> -> vector<256x8xbf16>
    %c0_34 = arith.constant 0 : index
    %c0_35 = arith.constant 0 : index
    %55 = vector.load %arg6[%c0_34, %c0_35] : memref<8x8xbf16, #tpu.memory_space<vmem>>, vector<8x8xbf16>
    %cst_36 = arith.constant dense<0.000000e+00> : vector<256x8xf32>
    %56 = tpu.matmul %54, %55, %cst_36 {dimension_numbers = #tpu.dot_dimension_numbers<[1], [0], [0], [1], [0, 0, 1, 1], [], []>} : vector<256x8xbf16>, vector<8x8xbf16>, vector<256x8xf32> -> vector<256x8xf32>
    %c0_37 = arith.constant 0 : index
    %c0_38 = arith.constant 0 : index
    %57 = vector.load %arg7[%c0_37, %c0_38] : memref<1x8xf32, #tpu.memory_space<vmem>>, vector<1x8xf32>
    %58 = vector.broadcast %57 : vector<1x8xf32> to vector<256x8xf32>
    %59 = arith.addf %56, %58 : vector<256x8xf32>
    %60 = vector.shape_cast %59 : vector<256x8xf32> to vector<16x16x8xf32>
    %61 = arith.truncf %60 : vector<16x16x8xf32> to vector<16x16x8xbf16>
    %c0_39 = arith.constant 0 : index
    %62 = arith.index_cast %49 : i32 to index
    %c0_40 = arith.constant 0 : index
    %c0_41 = arith.constant 0 : index
    %63 = vector.load %arg8[%c0_39, %62, %c0_40, %c0_41] : memref<1x16x16x8xbf16, #tpu.memory_space<vmem>>, vector<1x16x16x8xbf16>
    %64 = vector.shape_cast %63 : vector<1x16x16x8xbf16> to vector<16x16x8xbf16>
    %65 = vector.shape_cast %61 : vector<16x16x8xbf16> to vector<1x16x16x8xbf16>
    tpu.vector_store %arg8[%c0_39, %62, %c0_40, %c0_41], %65 {strides = array<i32>} : memref<1x16x16x8xbf16, #tpu.memory_space<vmem>>, vector<1x16x16x8xbf16>,
    %c1_i32 = arith.constant 1 : i32
    return
  }
  func.func @transform_0(%arg0: i32) -> (i32, i32, i32, i32) {
    %c0_i32 = arith.constant 0 : i32
    %c0_i32_0 = arith.constant 0 : i32
    %c0_i32_1 = arith.constant 0 : i32
    %c0_i32_2 = arith.constant 0 : i32
    return %arg0, %c0_i32, %c0_i32_0, %c0_i32_1 : i32, i32, i32, i32
  }
  func.func @transform_1(%arg0: i32) -> (i32, i32) {
    %c0_i32 = arith.constant 0 : i32
    %c0_i32_0 = arith.constant 0 : i32
    %c0_i32_1 = arith.constant 0 : i32
    return %c0_i32, %c0_i32_0 : i32, i32
  }
  func.func @transform_2(%arg0: i32) -> (i32, i32) {
    %c0_i32 = arith.constant 0 : i32
    %c0_i32_0 = arith.constant 0 : i32
    %c0_i32_1 = arith.constant 0 : i32
    return %c0_i32, %c0_i32_0 : i32, i32
  }
  func.func @transform_3(%arg0: i32) -> (i32, i32, i32) {
    %c0_i32 = arith.constant 0 : i32
    %c0_i32_0 = arith.constant 0 : i32
    %c0_i32_1 = arith.constant 0 : i32
    %c0_i32_2 = arith.constant 0 : i32
    return %c0_i32, %c0_i32_0, %c0_i32_1 : i32, i32, i32
  }
  func.func @transform_4(%arg0: i32) -> (i32, i32) {
    %c0_i32 = arith.constant 0 : i32
    %c0_i32_0 = arith.constant 0 : i32
    %c0_i32_1 = arith.constant 0 : i32
    return %c0_i32, %c0_i32_0 : i32, i32
  }
  func.func @transform_5(%arg0: i32) -> (i32, i32) {
    %c0_i32 = arith.constant 0 : i32
    %c0_i32_0 = arith.constant 0 : i32
    %c0_i32_1 = arith.constant 0 : i32
    return %c0_i32, %c0_i32_0 : i32, i32
  }
  func.func @transform_6(%arg0: i32) -> (i32, i32) {
    %c0_i32 = arith.constant 0 : i32
    %c0_i32_0 = arith.constant 0 : i32
    %c0_i32_1 = arith.constant 0 : i32
    return %c0_i32, %c0_i32_0 : i32, i32
  }
  func.func @transform_7(%arg0: i32) -> (i32, i32, i32, i32) {
    %c0_i32 = arith.constant 0 : i32
    %c0_i32_0 = arith.constant 0 : i32
    %c0_i32_1 = arith.constant 0 : i32
    %c0_i32_2 = arith.constant 0 : i32
    return %arg0, %c0_i32, %c0_i32_0, %c0_i32_1 : i32, i32, i32, i32
  }
}

</mosaic_0001>

<bundles_post_ra>
// kernel: tpu_custom_call.1
= control target key start
LH: loop header
LB: loop body
LE: loop exit
PB: predicated region body
PF: predicated region fallthrough
CT: control target
= control target key end

     0   :  { %s3091_s24 = smov 0   ;;  %s3832_s0 = inlined_call_operand.vmem [shape: bf16[2,16,16,4], index: 0, kind: input, shape index: {}]   ;;  %s3833_s1 = inlined_call_operand.vmem [shape: bf16[4,4], index: 1, kind: input, shape index: {}]   ;;  %s3834_s2 = inlined_call_operand.vmem [shape: f32[1,4], index: 2, kind: input, shape index: {}]   ;;  %s3835_s3 = inlined_call_operand.vmem [shape: bf16[3,12,4], index: 3, kind: input, shape index: {}]   ;;  %s3836_s4 = inlined_call_operand.vmem [shape: f32[1,4], index: 4, kind: input, shape index: {}]   ;;  %s3837_s5 = inlined_call_operand.vmem [shape: bf16[8,8], index: 5, kind: input, shape index: {}]   ;;  %s3838_s6 = inlined_call_operand.vmem [shape: f32[1,8], index: 6, kind: input, shape index: {}]   ;;  %s3839_s7 = inlined_call_operand.vmem [shape: bf16[2,16,16,8], index: 7, kind: output, shape index: {}]  }
   0x1 LB: > { %s2468_s25 = sadd.s32 4294967295, %s3046_s24   ;;  %p2472_p0 = scmp.ge.s32.totalorder %s3046_s24, 1  ;;  %s3046_s24 = sphi %s3091_s24, %s17_s24  }
   0x2   : > { %p237_p1 = scmp.lt.s32.totalorder %s3046_s24, 3 }
   0x4   : > { %p238_p2 = pnand %p2472_p0, %p237_p1 }
   0x5   : > { %v312_v0 = vld [vmem:[%s3833_s1] sm:$0x3] (!%p238_p2)  ;;  %vm449_vm0 = vcmask (!%p238_p2), 1041408   ;;  %p269_p3 = scmp.lt.s32.totalorder (!%p238_p2), %s2468_s25, 1  ;;  %vm400_vm1 = vcmask (!%p238_p2), 31744   ;;  %vm857_vm2 = vcmask (!%p238_p2), 1047552  }
   0x6   : > { %241 = sbr.rel (%p238_p2) target bundleno = 1003 (0x3eb), region = 48  ;;  %2988 = vmatprep.subr.msk.bf16.mxu0 (!%p238_p2), %vm449_vm0, %v312_v0  ;;  %v451_v1 = vsel (!%p238_p2), %vm449_vm0, %v312_v0, 0  ;;  %v3147_v18 = vld [vmem:[%s3834_s2] ss:$0 sm:$0xff] (!%p238_p2)  ;;  %s3048_s11 = smov (!%p238_p2), 4   ;;  %vm1163_vm4 = vcmask (!%p238_p2), 1045504  }
   0x7   : > { %2753 = vmatpush3.bf16.msra.mxu0 (!%p238_p2), %v451_v1  ;;  %vm858_vm3 = vsmask.f32 (!%p238_p2), 7424  ;;  %s3049_s14 = smov (!%p238_p2), 8   ;;  %vm1069_vm6 = vcmask (!%p238_p2), 97280   ;;  %vm790_vm7 = vcmask (!%p238_p2), 1040384   ;;  %vm1020_vm10 = vcmask (!%p238_p2), 64512  }
   0x8   : > { %vm3266_vm5 = vmand (!%p238_p2), %vm857_vm2, %vm858_vm3  ;;  %vm791_vm8 = vsmask.f32 (!%p238_p2), 256  ;;  %vm2087_vm11 = vcmask (!%p238_p2), 1043456   ;;  %vm2380_vm12 = vcmask (!%p238_p2), 60416  }
   0x9   : > { %vm3402_vm9 = vmand (!%p238_p2), %vm790_vm7, %vm791_vm8 }
   0xd   : > { %s3845_s25 = smov (!%p269_p3, %s2468_s25), 1 }
   0xe   : > { %s2633_s28 = sshll.u32 %s3845_s25, 7 }
   0xf   : > { %s3110_s8 = scalar_lea.vmem %s3832_s0, %s2633_s28  ;;  %s3732_s30 = scalar_lea.vmem %s3839_s7, %s2633_s28 }
  0x10   : > { %v3005_v2 = vld [vmem:[%s3110_s8] sm:$0xff]   ;;  %v3006_v3 = vld [vmem:[%s3110_s8 + $0x8] sm:$0xff]   ;;  %v3007_v4 = vld [vmem:[%s3110_s8 + $0x10] sm:$0xff]  }
  0x11   : > { %2754 = vmatprep.mubr.msk.bf16.mxu0 %vm400_vm1, %v3005_v2  ;;  %v3008_v5 = vld [vmem:[%s3110_s8 + $0x18] sm:$0xff]   ;;  %v3009_v6 = vld [vmem:[%s3110_s8 + $0x20] sm:$0xff]   ;;  %v3010_v7 = vld [vmem:[%s3110_s8 + $0x28] sm:$0xff]  }
  0x12   : > { %2755 = vmatmul.mubr.msk.bf16.vlgmr.msra.gmra.mrb[0].mxu0 %vm400_vm1, %v3006_v3  ;;  %v3011_v8 = vld [vmem:[%s3110_s8 + $0x30] sm:$0xff]   ;;  %v3012_v9 = vld [vmem:[%s3110_s8 + $0x38] sm:$0xff]   ;;  %v3013_v10 = vld [vmem:[%s3110_s8 + $0x40] sm:$0xff]  }
  0x13   : > { %2758 = vmatprep.mubr.msk.bf16.mxu0 %vm400_vm1, %v3007_v4  ;;  %v3014_v11 = vld [vmem:[%s3110_s8 + $0x48] sm:$0xff]   ;;  %v3015_v12 = vld [vmem:[%s3110_s8 + $0x50] sm:$0xff]   ;;  %v3016_v13 = vld [vmem:[%s3110_s8 + $0x58] sm:$0xff]  }
  0x14   : > { %v3017_v14 = vld [vmem:[%s3110_s8 + $0x60] sm:$0xff]   ;;  %v3018_v15 = vld [vmem:[%s3110_s8 + $0x68] sm:$0xff]   ;;  %v3019_v16 = vld [vmem:[%s3110_s8 + $0x70] sm:$0xff]  }
  0x15   : > { %v3020_v17 = vld [vmem:[%s3110_s8 + $0x78] sm:$0xff]  }
  0x1a   : > { %2759 = vmatmul.mubr.msk.bf16.gmra.mrb[4].mxu0 %vm400_vm1, %v3008_v5 }
  0x1b   : > { %2762 = vmatprep.mubr.msk.bf16.mxu0 %vm400_vm1, %v3009_v6 }
  0x22   : > { %2763 = vmatmul.mubr.msk.bf16.gmra.mrb[8].mxu0 %vm400_vm1, %v3010_v7 }
  0x23   : > { %2766 = vmatprep.mubr.msk.bf16.mxu0 %vm400_vm1, %v3011_v8 }
  0x2a   : > { %2767 = vmatmul.mubr.msk.bf16.gmra.mrb[12].mxu0 %vm400_vm1, %v3012_v9 }
  0x2b   : > { %2770 = vmatprep.mubr.msk.bf16.mxu0 %vm400_vm1, %v3013_v10 }
  0x32   : > { %2771 = vmatmul.mubr.msk.bf16.gmra.mrb[16].mxu0 %vm400_vm1, %v3014_v11 }
  0x33   : > { %2774 = vmatprep.mubr.msk.bf16.mxu0 %vm400_vm1, %v3015_v12 }
  0x3a   : > { %2775 = vmatmul.mubr.msk.bf16.gmra.mrb[20].mxu0 %vm400_vm1, %v3016_v13 }
  0x3b   : > { %2778 = vmatprep.mubr.msk.bf16.mxu0 %vm400_vm1, %v3017_v14 }
  0x42   : > { %2779 = vmatmul.mubr.msk.bf16.gmra.mrb[24].mxu0 %vm400_vm1, %v3018_v15 }
  0x43   : > { %2782 = vmatprep.mubr.msk.bf16.mxu0 %vm400_vm1, %v3019_v16 }
  0x4a   : > { %2783 = vmatmul.mubr.msk.bf16.gmra.mrb[28].mxu0 %vm400_vm1, %v3020_v17 }
  0xe5   : > { %v2756_v19 = vpop.f32.mrb[0].mxu0 }
  0xe6   : > { %v496_v20 = vadd.f32 %v2756_v19, %v3147_v18  ;;  %v487_v21 = vpop.f32.mrb[1].mxu0 }
  0xe7   : > { %v488_v22 = vadd.f32 %v3147_v18, %v487_v21  ;;  %v2757_v23 = vpop.f32.mrb[2].mxu0 }
  0xe8   : > { %v499_v24 = vadd.f32 %v2757_v23, %v3147_v18  ;;  %v490_v25 = vpop.f32.mrb[3].mxu0  ;;  %v616_v27 = vmax.f32 %v496_v20, 0.0 }
  0xe9   : > { %v491_v26 = vadd.f32 %v3147_v18, %v490_v25  ;;  %v614_v29 = vmax.f32 %v488_v22, 0.0 }
  0xea   : > { %v617_v28 = vmax.f32 %v499_v24, 0.0 }
  0xeb   : > { %v615_v30 = vmax.f32 %v491_v26, 0.0 }
  0xec   : > { %v3153_v31 = vpack.c.bf16 %v617_v28, %v616_v27 }
  0xed   : > { %v3155_v32 = vpack.c.bf16 %v615_v30, %v614_v29  ;;  %v2760_v33 = vpop.f32.mrb[4].mxu0 }
  0xee   : > { %v512_v34 = vadd.f32 %v2760_v33, %v3147_v18  ;;  %v503_v35 = vpop.f32.mrb[5].mxu0  ;;  %v670_v36 = vshrl.u32 %v3153_v31, 16  ;;  %v673_v40 = vshll.u32 %v3153_v31, 16 }
  0xef   : > { %v504_v37 = vadd.f32 %v3147_v18, %v503_v35  ;;  %v2761_v38 = vpop.f32.mrb[6].mxu0  ;;  %v663_v39 = vshrl.u32 %v3155_v32, 16  ;;  %v666_v44 = vshll.u32 %v3155_v32, 16 }
  0xf0   : > { %v515_v41 = vadd.f32 %v2761_v38, %v3147_v18  ;;  %v506_v42 = vpop.f32.mrb[7].mxu0  ;;  %v672_v43 = vrot.slane %v670_v36, 7  ;;  %v620_v47 = vmax.f32 %v512_v34, 0.0 }
  0xf1   : > { %v507_v45 = vadd.f32 %v3147_v18, %v506_v42  ;;  %v665_v46 = vrot.slane %v663_v39, 7  ;;  %v618_v50 = vmax.f32 %v504_v37, 0.0 }
  0xf2   : > { %v621_v48 = vmax.f32 %v515_v41, 0.0  ;;  %v3171_v49 = vor.u32 %v673_v40, %v672_v43 }
  0xf3   : > { %v619_v51 = vmax.f32 %v507_v45, 0.0  ;;  %v3175_v52 = vor.u32 %v666_v44, %v665_v46 }
  0xf4   : > { %v3177_v53 = vpack.c.bf16 %v621_v48, %v620_v47 }
  0xf5   : > { %v3179_v54 = vpack.c.bf16 %v619_v51, %v618_v50  ;;  %v2764_v55 = vpop.f32.mrb[8].mxu0 }
  0xf6   : > { %v528_v56 = vadd.f32 %v2764_v55, %v3147_v18  ;;  %v519_v57 = vpop.f32.mrb[9].mxu0  ;;  %v684_v58 = vshrl.u32 %v3177_v53, 16  ;;  %v687_v62 = vshll.u32 %v3177_v53, 16 }
  0xf7   : > { %v520_v59 = vadd.f32 %v3147_v18, %v519_v57  ;;  %v2765_v60 = vpop.f32.mrb[10].mxu0  ;;  %v677_v61 = vshrl.u32 %v3179_v54, 16  ;;  %v680_v2 = vshll.u32 %v3179_v54, 16 }
  0xf8   : > { %v531_v63 = vadd.f32 %v2765_v60, %v3147_v18  ;;  %v522_v0 = vpop.f32.mrb[11].mxu0  ;;  %v686_v1 = vrot.slane %v684_v58, 7  ;;  %v624_v5 = vmax.f32 %v528_v56, 0.0 }
  0xf9   : > { %v523_v3 = vadd.f32 %v3147_v18, %v522_v0  ;;  %v679_v4 = vrot.slane %v677_v61, 7  ;;  %v622_v8 = vmax.f32 %v520_v59, 0.0 }
  0xfa   : > { %v625_v6 = vmax.f32 %v531_v63, 0.0  ;;  %v3195_v7 = vor.u32 %v687_v62, %v686_v1 }
  0xfb   : > { %v623_v9 = vmax.f32 %v523_v3, 0.0  ;;  %v3199_v10 = vor.u32 %v680_v2, %v679_v4 }
  0xfc   : > { %v3201_v11 = vpack.c.bf16 %v625_v6, %v624_v5 }
  0xfd   : > { %v3203_v12 = vpack.c.bf16 %v623_v9, %v622_v8  ;;  %v2768_v13 = vpop.f32.mrb[12].mxu0 }
  0xfe   : > { %v544_v14 = vadd.f32 %v2768_v13, %v3147_v18  ;;  %v535_v15 = vpop.f32.mrb[13].mxu0  ;;  %v698_v16 = vshrl.u32 %v3201_v11, 16  ;;  %v701_v21 = vshll.u32 %v3201_v11, 16 }
  0xff   : > { %v536_v17 = vadd.f32 %v3147_v18, %v535_v15  ;;  %v2769_v19 = vpop.f32.mrb[14].mxu0  ;;  %v691_v20 = vshrl.u32 %v3203_v12, 16  ;;  %v694_v25 = vshll.u32 %v3203_v12, 16 }
 0x100   : > { %v547_v22 = vadd.f32 %v2769_v19, %v3147_v18  ;;  %v538_v23 = vpop.f32.mrb[15].mxu0  ;;  %v700_v24 = vrot.slane %v698_v16, 7  ;;  %v628_v28 = vmax.f32 %v544_v14, 0.0 }
 0x101   : > { %v539_v26 = vadd.f32 %v3147_v18, %v538_v23  ;;  %v693_v27 = vrot.slane %v691_v20, 7  ;;  %v626_v33 = vmax.f32 %v536_v17, 0.0 }
 0x102   : > { %v629_v29 = vmax.f32 %v547_v22, 0.0  ;;  %v3219_v30 = vor.u32 %v701_v21, %v700_v24 }
 0x103   : > { %v627_v34 = vmax.f32 %v539_v26, 0.0  ;;  %v3223_v35 = vor.u32 %v694_v25, %v693_v27 }
 0x104   : > { %v3225_v37 = vpack.c.bf16 %v629_v29, %v628_v28 }
 0x105   : > { %v3227_v38 = vpack.c.bf16 %v627_v34, %v626_v33  ;;  %v2772_v41 = vpop.f32.mrb[16].mxu0  ;;  %v3021_v34 = vld [vmem:[%s3835_s3 + $0x8] sm:$0x3f]  }
 0x106   : > { %v560_v42 = vadd.f32 %v2772_v41, %v3147_v18  ;;  %v551_v43 = vpop.f32.mrb[17].mxu0  ;;  %v712_v45 = vshrl.u32 %v3225_v37, 16  ;;  %v715_v50 = vshll.u32 %v3225_v37, 16  ;;  %2990 = vmatprep.subr.msk.bf16.mxu1 %vm1163_vm4, %v3021_v34  ;;  %2989 = vmatprep.subr.msk.bf16.mxu0 %vm1163_vm4, %v3021_v34 }
 0x107   : > { %v552_v46 = vadd.f32 %v3147_v18, %v551_v43  ;;  %v2773_v47 = vpop.f32.mrb[18].mxu0  ;;  %v705_v48 = vshrl.u32 %v3227_v38, 16  ;;  %v708_v57 = vshll.u32 %v3227_v38, 16 }
 0x108   : > { %v563_v51 = vadd.f32 %v2773_v47, %v3147_v18  ;;  %v554_v55 = vpop.f32.mrb[19].mxu0  ;;  %v714_v56 = vrot.slane %v712_v45, 7  ;;  %v632_v63 = vmax.f32 %v560_v42, 0.0 }
 0x109   : > { %v555_v59 = vadd.f32 %v3147_v18, %v554_v55  ;;  %v707_v60 = vrot.slane %v705_v48, 7  ;;  %v630_v3 = vmax.f32 %v552_v46, 0.0 }
 0x10a   : > { %v633_v0 = vmax.f32 %v563_v51, 0.0  ;;  %v3243_v1 = vor.u32 %v715_v50, %v714_v56 }
 0x10b   : > { %v631_v4 = vmax.f32 %v555_v59, 0.0  ;;  %v3247_v5 = vor.u32 %v708_v57, %v707_v60 }
 0x10c   : > { %v655_v6 = vpack.c.bf16 %v633_v0, %v632_v63  ;;  %v1165_v63 = vsel %vm1163_vm4, %v3021_v34, 0 }
 0x10d   : > { %v654_v8 = vpack.c.bf16 %v631_v4, %v630_v3  ;;  %v2776_v9 = vpop.f32.mrb[20].mxu0  ;;  %2923 = vmatpush3.bf16.msra.mxu1 %v1165_v63  ;;  %2787 = vmatpush3.bf16.msra.mxu0 %v1165_v63 }
 0x10e   : > { %v729_v13 = vshll.u32 %v655_v6, 16  ;;  %v576_v14 = vadd.f32 %v2776_v9, %v3147_v18  ;;  %v567_v15 = vpop.f32.mrb[21].mxu0  ;;  %v726_v17 = vshrl.u32 %v655_v6, 16 }
 0x10f   : > { %v568_v19 = vadd.f32 %v3147_v18, %v567_v15  ;;  %v2777_v22 = vpop.f32.mrb[22].mxu0  ;;  %908 = vrot.lane.b32.xlu0 %v654_v8, %s3048_s11  ;;  %v719_v23 = vshrl.u32 %v654_v8, 16  ;;  %v722_v24 = vshll.u32 %v654_v8, 16 }
 0x110   : > { %v636_v26 = vmax.f32 %v576_v14, 0.0  ;;  %v579_v27 = vadd.f32 %v2777_v22, %v3147_v18  ;;  %v570_v28 = vpop.f32.mrb[23].mxu0  ;;  %v728_v29 = vrot.slane %v726_v17, 7  ;;  %v827_v33 = vrot.slane %v729_v13, 1 }
 0x111   : > { %v634_v41 = vmax.f32 %v568_v19, 0.0  ;;  %v571_v42 = vadd.f32 %v3147_v18, %v570_v28  ;;  %v825_v43 = vrot.slane %v722_v24, 1  ;;  %v721_v46 = vrot.slane %v719_v23, 7 }
 0x112   : > { %v637_v47 = vmax.f32 %v579_v27, 0.0  ;;  %v828_v51 = vor.u32 %v827_v33, %v726_v17  ;;  %v3257_v55 = vor.u32 %v729_v13, %v728_v29  ;;  %v3278_v17 = vld [vmem:[%s3835_s3] sm:$0x3f]  }
 0x113   : > { %v635_v56 = vmax.f32 %v571_v42, 0.0  ;;  %910 = vrot.lane.b32.xlu0 %v655_v6, %s3048_s11  ;;  %v826_v59 = vor.u32 %v825_v43, %v719_v23  ;;  %v3260_v60 = vor.u32 %v722_v24, %v721_v46  ;;  %2991 = vmatprep.subr.msk.bf16.mxu1 %vm1163_vm4, %v3278_v17 }
 0x114   : > { %v657_v0 = vpack.c.bf16 %v637_v47, %v636_v26  ;;  %v869_v24 = vsel %vm3266_vm5, %v828_v51, 0 }
 0x115   : > { %v656_v4 = vpack.c.bf16 %v635_v56, %v634_v41  ;;  %v2780_v8 = vpop.f32.mrb[24].mxu0  ;;  %v868_v6 = vsel %vm3266_vm5, %v826_v59, 0 }
 0x116   : > { %v743_v9 = vshll.u32 %v657_v0, 16  ;;  %v592_v13 = vadd.f32 %v2780_v8, %v3147_v18  ;;  %v583_v14 = vpop.f32.mrb[25].mxu0  ;;  %956 = vrot.lane.b32.xlu1 %v868_v6, %s3049_s14  ;;  %v740_v15 = vshrl.u32 %v657_v0, 16 }
 0x117   : > { %v736_v19 = vshll.u32 %v656_v4, 16  ;;  %v584_v22 = vadd.f32 %v3147_v18, %v583_v14  ;;  %v2781_v23 = vpop.f32.mrb[26].mxu0  ;;  %912 = vrot.lane.b32.xlu0 %v656_v4, %s3048_s11  ;;  %v733_v26 = vshrl.u32 %v656_v4, 16 }
 0x118   : > { %v640_v27 = vmax.f32 %v592_v13, 0.0  ;;  %v595_v28 = vadd.f32 %v2781_v23, %v3147_v18  ;;  %v586_v29 = vpop.f32.mrb[27].mxu0  ;;  %v742_v33 = vrot.slane %v740_v15, 7  ;;  %v831_v34 = vrot.slane %v743_v9, 1 }
 0x119   : > { %v638_v41 = vmax.f32 %v584_v22, 0.0  ;;  %v587_v42 = vadd.f32 %v3147_v18, %v586_v29  ;;  %v735_v43 = vrot.slane %v733_v26, 7  ;;  %v829_v46 = vrot.slane %v736_v19, 1 }
 0x11a   : > { %v641_v47 = vmax.f32 %v595_v28, 0.0  ;;  %958 = vrot.lane.b32.xlu1 %v869_v24, %s3049_s14  ;;  %v3289_v56 = vor.u32 %v743_v9, %v742_v33  ;;  %v832_v63 = vor.u32 %v831_v34, %v740_v15 }
 0x11b   : > { %v639_v51 = vmax.f32 %v587_v42, 0.0  ;;  %v830_v59 = vor.u32 %v829_v46, %v733_v26  ;;  %v3291_v4 = vor.u32 %v736_v19, %v735_v43 }
 0x11c   : > { %v659_v8 = vpack.c.bf16 %v641_v47, %v640_v27  ;;  %v871_v26 = vsel %vm3266_vm5, %v832_v63, 0 }
 0x11d   : > { %v658_v6 = vpack.c.bf16 %v639_v51, %v638_v41  ;;  %v2784_v13 = vpop.f32.mrb[28].mxu0  ;;  %v870_v14 = vsel %vm3266_vm5, %v830_v59, 0 }
 0x11e   : > { %v757_v22 = vshll.u32 %v659_v8, 16  ;;  %v608_v23 = vadd.f32 %v2784_v13, %v3147_v18  ;;  %v599_v29 = vpop.f32.mrb[29].mxu0  ;;  %960 = vrot.lane.b32.xlu0 %v870_v14, %s3049_s14  ;;  %914 = vrot.lane.b32.xlu1 %v657_v0, %s3048_s11  ;;  %v754_v9 = vshrl.u32 %v659_v8, 16 }
 0x11f   : > { %v750_v24 = vshll.u32 %v658_v6, 16  ;;  %v600_v15 = vadd.f32 %v3147_v18, %v599_v29  ;;  %v2785_v19 = vpop.f32.mrb[30].mxu0  ;;  %v747_v27 = vshrl.u32 %v658_v6, 16 }
 0x120   : > { %v644_v28 = vmax.f32 %v608_v23, 0.0  ;;  %v611_v33 = vadd.f32 %v2785_v19, %v3147_v18  ;;  %v602_v34 = vpop.f32.mrb[31].mxu0  ;;  %v756_v41 = vrot.slane %v754_v9, 7  ;;  %v835_v42 = vrot.slane %v757_v22, 1 }
 0x121   : > { %v642_v43 = vmax.f32 %v600_v15, 0.0  ;;  %v603_v46 = vadd.f32 %v3147_v18, %v602_v34  ;;  %v749_v47 = vrot.slane %v747_v27, 7  ;;  %v833_v0 = vrot.slane %v750_v24, 1 }
 0x122   : > { %v645_v51 = vmax.f32 %v611_v33, 0.0  ;;  %916 = vrot.lane.b32.xlu0 %v658_v6, %s3048_s11  ;;  %962 = vrot.lane.b32.xlu1 %v871_v26, %s3049_s14  ;;  %v3305_v59 = vor.u32 %v757_v22, %v756_v41  ;;  %v836_v19 = vor.u32 %v835_v42, %v754_v9 }
 0x123   : > { %v643_v63 = vmax.f32 %v603_v46, 0.0  ;;  %v834_v13 = vor.u32 %v833_v0, %v747_v27  ;;  %v3307_v14 = vor.u32 %v750_v24, %v749_v47  ;;  %v809_v46 = vrot.slane %v666_v44, 1 }
 0x124   : > { %v661_v23 = vpack.c.bf16 %v645_v51, %v644_v28  ;;  %v873_v27 = vsel %vm3266_vm5, %v836_v19, 0  ;;  %v3050_v47 = vmov 0  }
 0x125   : > { %v660_v29 = vpack.c.bf16 %v643_v63, %v642_v43  ;;  %v872_v15 = vsel %vm3266_vm5, %v834_v13, 0  ;;  %1086 = vst.msk [vmem:[#allocation2] sm:$0xff] %vm1069_vm6, %v3050_v47  ;;  %1087 = vst.msk [vmem:[#allocation2 + $0x88] sm:$0xff] %vm1069_vm6, %v3050_v47  ;;  %v810_v51 = vor.u32 %v809_v46, %v663_v39  ;;  %v811_v63 = vrot.slane %v673_v40, 1 }
 0x126   : > { %v771_v18 = vshll.u32 %v661_v23, 16  ;;  %964 = vrot.lane.b32.xlu0 %v872_v15, %s3049_s14  ;;  %918 = vrot.lane.b32.xlu1 %v659_v8, %s3048_s11  ;;  %v768_v6 = vshrl.u32 %v661_v23, 16  ;;  %v815_v40 = vrot.slane %v687_v62, 1  ;;  %v819_v62 = vrot.slane %v701_v21, 1 }
 0x127   : > { %v764_v33 = vshll.u32 %v660_v29, 16  ;;  %v761_v26 = vshrl.u32 %v660_v29, 16  ;;  %v860_v44 = vsel %vm3266_vm5, %v810_v51, 0  ;;  %v812_v13 = vor.u32 %v811_v63, %v670_v36 }
 0x128   : > { %v770_v22 = vrot.slane %v768_v6, 7  ;;  %v839_v28 = vrot.slane %v771_v18, 1  ;;  %v823_v21 = vrot.slane %v715_v50, 1  ;;  %v802_v15 = vsel %vm3402_vm9, 0, %v3257_v55 }
 0x129   : > { %v763_v24 = vrot.slane %v761_v26, 7  ;;  %v837_v34 = vrot.slane %v764_v33, 1  ;;  %v861_v39 = vsel %vm3266_vm5, %v812_v13, 0  ;;  %v804_v55 = vsel %vm3402_vm9, 0, %v3289_v56 }
 0x12a   : > { %920 = vrot.lane.b32.xlu0 %v660_v29, %s3048_s11  ;;  %966 = vrot.lane.b32.xlu1 %v873_v27, %s3049_s14  ;;  %v3317_v9 = vor.u32 %v771_v18, %v770_v22  ;;  %v840_v43 = vor.u32 %v839_v28, %v768_v6  ;;  %v805_v56 = vsel %vm3402_vm9, 0, %v3307_v14  ;;  %v806_v14 = vsel %vm3402_vm9, 0, %v3305_v59 }
 0x12b   : > { %v838_v41 = vor.u32 %v837_v34, %v761_v26  ;;  %v3319_v42 = vor.u32 %v764_v33, %v763_v24 }
 0x12c   : > { %v875_v0 = vsel %vm3266_vm5, %v840_v43, 0  ;;  %v3437_v43 = vld [vmem:[%s3835_s3 + $0x10] sm:$0x3f]  }
 0x12d   : > { %v874_v8 = vsel %vm3266_vm5, %v838_v41, 0 }
 0x12e   : > { %968 = vrot.lane.b32.xlu0 %v874_v8, %s3049_s14  ;;  %922 = vrot.lane.b32.xlu1 %v661_v23, %s3048_s11  ;;  %v813_v23 = vrot.slane %v680_v2, 1  ;;  %v817_v2 = vrot.slane %v694_v25, 1  ;;  %v821_v25 = vrot.slane %v708_v57, 1  ;;  %v1337_v8 = vsel %vm1163_vm4, %v3278_v17, 0 }
 0x132   : > { %970 = vrot.lane.b32.xlu1 %v875_v0, %s3049_s14  ;;  %892 = vrot.lane.b32.xlu0 %v3155_v32, %s3048_s11  ;;  %v814_v32 = vor.u32 %v813_v23, %v677_v61 }
 0x134   : > { %v862_v36 = vsel %vm3266_vm5, %v814_v32, 0 }
 0x136   : > { %894 = vrot.lane.b32.xlu0 %v3153_v31, %s3048_s11  ;;  %940 = vrot.lane.b32.xlu1 %v860_v44, %s3049_s14  ;;  %v816_v31 = vor.u32 %v815_v40, %v684_v58 }
 0x138   : > { %v863_v61 = vsel %vm3266_vm5, %v816_v31, 0 }
 0x13a   : > { %942 = vrot.lane.b32.xlu0 %v861_v39, %s3049_s14  ;;  %896 = vrot.lane.b32.xlu1 %v3179_v54, %s3048_s11  ;;  %v818_v54 = vor.u32 %v817_v2, %v691_v20 }
 0x13c   : > { %v864_v58 = vsel %vm3266_vm5, %v818_v54, 0 }
 0x13e   : > { %898 = vrot.lane.b32.xlu0 %v3177_v53, %s3048_s11  ;;  %944 = vrot.lane.b32.xlu1 %v862_v36, %s3049_s14  ;;  %v820_v53 = vor.u32 %v819_v62, %v698_v16  ;;  %v807_v36 = vsel %vm3402_vm9, 0, %v3319_v42  ;;  %v808_v62 = vsel %vm3402_vm9, 0, %v3317_v9 }
 0x140   : > { %v865_v20 = vsel %vm3266_vm5, %v820_v53, 0 }
 0x142   : > { %946 = vrot.lane.b32.xlu0 %v863_v61, %s3049_s14  ;;  %900 = vrot.lane.b32.xlu1 %v3203_v12, %s3048_s11  ;;  %v822_v12 = vor.u32 %v821_v25, %v705_v48 }
 0x144   : > { %v866_v16 = vsel %vm3266_vm5, %v822_v12, 0  ;;  %v793_v12 = vsel %vm3402_vm9, 0, %v3175_v52 }
 0x146   : > { %902 = vrot.lane.b32.xlu0 %v3201_v11, %s3048_s11  ;;  %948 = vrot.lane.b32.xlu1 %v864_v58, %s3049_s14  ;;  %v824_v11 = vor.u32 %v823_v21, %v712_v45 }
 0x148   : > { %v867_v48 = vsel %vm3266_vm5, %v824_v11, 0 }
 0x14a   : > { %950 = vrot.lane.b32.xlu0 %v865_v20, %s3049_s14  ;;  %904 = vrot.lane.b32.xlu1 %v3227_v38, %s3048_s11 }
 0x14e   : > { %906 = vrot.lane.b32.xlu0 %v3225_v37, %s3048_s11  ;;  %952 = vrot.lane.b32.xlu1 %v866_v16, %s3049_s14  ;;  %v801_v37 = vsel %vm3402_vm9, 0, %v3260_v60  ;;  %v803_v60 = vsel %vm3402_vm9, 0, %v3291_v4 }
 0x152   : > { %954 = vrot.lane.b32.xlu1 %v867_v48, %s3049_s14 }
 0x181   : > { %v909_v50 = vpop.permute.xlu0 %908 }
 0x182   : > { %v998_v45 = vsel %vm400_vm1, %v801_v37, %v909_v50  ;;  %v794_v50 = vsel %vm3402_vm9, 0, %v3171_v49  ;;  %v795_v49 = vsel %vm3402_vm9, 0, %v3199_v10  ;;  %v796_v10 = vsel %vm3402_vm9, 0, %v3195_v7 }
 0x183   : > { %v797_v7 = vsel %vm3402_vm9, 0, %v3223_v35  ;;  %v798_v35 = vsel %vm3402_vm9, 0, %v3219_v30  ;;  %v799_v30 = vsel %vm3402_vm9, 0, %v3247_v5  ;;  %v800_v5 = vsel %vm3402_vm9, 0, %v3243_v1 }
 0x185   : > { %v911_v57 = vpop.permute.xlu0 %910 }
 0x186   : > { %v1001_v19 = vsel %vm400_vm1, %v802_v15, %v911_v57  ;;  %v3024_v15 = vld [vmem:[%s3110_s8 + $0x8] sm:$0xff]  }
 0x187   : > { %1969 = vrot.lane.b32.xlu1 %v3024_v15, %s3048_s11 }
 0x188   : > { %v957_v29 = vpop.permute.xlu1 %956 }
 0x189   : > { %v1046_v3 = vsel %vm1020_vm10, %v998_v45, %v957_v29  ;;  %v913_v18 = vpop.permute.xlu0 %912  ;;  %v1088_v45 = vld [vmem:[#allocation2] sm:$0xff] }
 0x18a   : > { %1078 = vst.msk [vmem:[#allocation2 + $0x48] sm:$0xff] %vm1069_vm6, %v1046_v3  ;;  %v1004_v26 = vsel %vm400_vm1, %v803_v60, %v913_v18  ;;  %v3026_v60 = vld [vmem:[%s3110_s8 + $0x18] sm:$0xff]  }
 0x18b   : > { %1973 = vrot.lane.b32.xlu1 %v3026_v60, %s3048_s11 }
 0x18c   : > { %v959_v6 = vpop.permute.xlu1 %958 }
 0x18d   : > { %v1049_v33 = vsel %vm1020_vm10, %v1001_v19, %v959_v6  ;;  %v3025_v19 = vld [vmem:[%s3110_s8] sm:$0xff]  }
 0x18e   : > { %1079 = vst.msk [vmem:[#allocation2 + $0x50] sm:$0xff] %vm1069_vm6, %v1049_v33  ;;  %1967 = vrot.lane.b32.xlu0 %v3025_v19, %s3048_s11 }
 0x190   : > { %v961_v22 = vpop.permute.xlu0 %960  ;;  %v915_v27 = vpop.permute.xlu1 %914 }
 0x191   : > { %v1052_v24 = vsel %vm1020_vm10, %v1004_v26, %v961_v22  ;;  %v3423_v34 = vld [vmem:[#allocation2 + $0x48] sm:$0xff]  ;;  %v1007_v28 = vsel %vm400_vm1, %v804_v55, %v915_v27  ;;  %v3027_v26 = vld [vmem:[%s3110_s8 + $0x10] sm:$0xff]  }
 0x192   : > { %1080 = vst.msk [vmem:[#allocation2 + $0x58] sm:$0xff] %vm1069_vm6, %v1052_v24  ;;  %2804 = vmatprep.mubr.msk.bf16.mxu1 %vm1069_vm6, %v3423_v34  ;;  %1971 = vrot.lane.b32.xlu0 %v3027_v26, %s3048_s11 }
 0x194   : > { %v917_v4 = vpop.permute.xlu0 %916  ;;  %v963_v41 = vpop.permute.xlu1 %962 }
 0x195   : > { %v1055_v46 = vsel %vm1020_vm10, %v1007_v28, %v963_v41  ;;  %v3440_v47 = vld [vmem:[#allocation2 + $0x50] sm:$0xff]  ;;  %v1010_v17 = vsel %vm400_vm1, %v805_v56, %v917_v4  ;;  %v1573_v4 = vsel %vm1163_vm4, %v3437_v43, 0  ;;  %v3028_v41 = vld [vmem:[%s3110_s8 + $0x28] sm:$0xff]  }
 0x196   : > { %1081 = vst.msk [vmem:[#allocation2 + $0x60] sm:$0xff] %vm1069_vm6, %v1055_v46  ;;  %2805 = vmatmul.mubr.msk.bf16.vlgmr.msra.gmra.mrb[0].mxu1 %vm1069_vm6, %v3440_v47  ;;  %1977 = vrot.lane.b32.xlu1 %v3028_v41, %s3048_s11 }
 0x197   : > { %2821 = vmatpush3.bf16.msra.mxu1 %v1337_v8  ;;  %v3029_v8 = vld [vmem:[%s3110_s8 + $0x20] sm:$0xff]  }
 0x198   : > { %v965_v0 = vpop.permute.xlu0 %964  ;;  %v919_v51 = vpop.permute.xlu1 %918  ;;  %2992 = vmatprep.subr.msk.bf16.mxu1 %vm1163_vm4, %v3437_v43  ;;  %1975 = vrot.lane.b32.xlu0 %v3029_v8, %s3048_s11 }
 0x199   : > { %v1058_v63 = vsel %vm1020_vm10, %v1010_v17, %v965_v0  ;;  %v3452_v44 = vld [vmem:[#allocation2 + $0x58] sm:$0xff]  ;;  %v1013_v13 = vsel %vm400_vm1, %v806_v14, %v919_v51 }
 0x19a   : > { %1082 = vst.msk [vmem:[#allocation2 + $0x68] sm:$0xff] %vm1069_vm6, %v1058_v63  ;;  %2808 = vmatprep.mubr.msk.bf16.mxu1 %vm1069_vm6, %v3452_v44  ;;  %v3030_v51 = vld [vmem:[%s3110_s8 + $0x38] sm:$0xff]   ;;  %v3031_v63 = vld [vmem:[%s3110_s8 + $0x30] sm:$0xff]  }
 0x19b   : > { %1981 = vrot.lane.b32.xlu1 %v3030_v51, %s3048_s11 }
 0x19c   : > { %v921_v23 = vpop.permute.xlu0 %920  ;;  %v967_v39 = vpop.permute.xlu1 %966  ;;  %1979 = vrot.lane.b32.xlu0 %v3031_v63, %s3048_s11 }
 0x19d   : > { %v1061_v32 = vsel %vm1020_vm10, %v1013_v13, %v967_v39  ;;  %v3462_v40 = vld [vmem:[#allocation2 + $0x60] sm:$0xff]  ;;  %v1016_v31 = vsel %vm400_vm1, %v807_v36, %v921_v23  ;;  %v3032_v36 = vld [vmem:[%s3110_s8 + $0x48] sm:$0xff]  }
 0x19e   : > { %1083 = vst.msk [vmem:[#allocation2 + $0x70] sm:$0xff] %vm1069_vm6, %v1061_v32  ;;  %2809 = vmatmul.mubr.msk.bf16.gmra.mrb[4].mxu1 %vm1069_vm6, %v3462_v40 }
 0x19f   : > { %1985 = vrot.lane.b32.xlu1 %v3032_v36, %s3048_s11 }
 0x1a0   : > { %v969_v59 = vpop.permute.xlu0 %968  ;;  %v923_v2 = vpop.permute.xlu1 %922 }
 0x1a1   : > { %v1064_v61 = vsel %vm1020_vm10, %v1016_v31, %v969_v59  ;;  %v3472_v54 = vld [vmem:[#allocation2 + $0x68] sm:$0xff]  ;;  %v1019_v58 = vsel %vm400_vm1, %v808_v62, %v923_v2  ;;  %v3033_v31 = vld [vmem:[%s3110_s8 + $0x40] sm:$0xff]  }
 0x1a2   : > { %1084 = vst.msk [vmem:[#allocation2 + $0x78] sm:$0xff] %vm1069_vm6, %v1064_v61  ;;  %2812 = vmatprep.mubr.msk.bf16.mxu1 %vm1069_vm6, %v3472_v54  ;;  %1983 = vrot.lane.b32.xlu0 %v3033_v31, %s3048_s11 }
 0x1a4   : > { %v971_v42 = vpop.permute.xlu1 %970  ;;  %v893_v53 = vpop.permute.xlu0 %892 }
 0x1a5   : > { %v1067_v25 = vsel %vm1020_vm10, %v1019_v58, %v971_v42  ;;  %v3482_v20 = vld [vmem:[#allocation2 + $0x70] sm:$0xff]  ;;  %v974_v21 = vsel %vm400_vm1, %v793_v12, %v893_v53  ;;  %v3034_v58 = vld [vmem:[%s3110_s8 + $0x58] sm:$0xff]  }
 0x1a6   : > { %1085 = vst.msk [vmem:[#allocation2 + $0x80] sm:$0xff] %vm1069_vm6, %v1067_v25  ;;  %2813 = vmatmul.mubr.msk.bf16.gmra.mrb[8].mxu1 %vm1069_vm6, %v3482_v20  ;;  %v3035_v42 = vld [vmem:[%s3110_s8 + $0x50] sm:$0xff]   ;;  %1989 = vrot.lane.b32.xlu1 %v3034_v58, %s3048_s11 }
 0x1a7   : > { %1987 = vrot.lane.b32.xlu0 %v3035_v42, %s3048_s11 }
 0x1a8   : > { %v895_v9 = vpop.permute.xlu0 %894  ;;  %v941_v16 = vpop.permute.xlu1 %940 }
 0x1a9   : > { %v1022_v11 = vsel %vm1020_vm10, %v974_v21, %v941_v16  ;;  %v3492_v48 = vld [vmem:[#allocation2 + $0x78] sm:$0xff]  ;;  %v977_v52 = vsel %vm400_vm1, %v794_v50, %v895_v9  ;;  %v3036_v50 = vld [vmem:[%s3110_s8 + $0x68] sm:$0xff]  }
 0x1aa   : > { %1070 = vst.msk [vmem:[#allocation2 + $0x8] sm:$0xff] %vm1069_vm6, %v1022_v11  ;;  %2816 = vmatprep.mubr.msk.bf16.mxu1 %vm1069_vm6, %v3492_v48  ;;  %1993 = vrot.lane.b32.xlu1 %v3036_v50, %s3048_s11 }
 0x1ac   : > { %v943_v57 = vpop.permute.xlu0 %942  ;;  %v897_v37 = vpop.permute.xlu1 %896 }
 0x1ad   : > { %v1025_v29 = vsel %vm1020_vm10, %v977_v52, %v943_v57  ;;  %v3502_v3 = vld [vmem:[#allocation2 + $0x80] sm:$0xff]  ;;  %v980_v18 = vsel %vm400_vm1, %v795_v49, %v897_v37  ;;  %v3038_v57 = vld [vmem:[%s3110_s8 + $0x78] sm:$0xff]   ;;  %v3039_v37 = vld [vmem:[%s3110_s8 + $0x70] sm:$0xff]  }
 0x1ae   : > { %1071 = vst.msk [vmem:[#allocation2 + $0x10] sm:$0xff] %vm1069_vm6, %v1025_v29  ;;  %2817 = vmatmul.mubr.msk.bf16.gmra.mrb[12].mxu1 %vm1069_vm6, %v3502_v3  ;;  %v3037_v52 = vld [vmem:[%s3110_s8 + $0x60] sm:$0xff]   ;;  %1997 = vrot.lane.b32.xlu1 %v3038_v57, %s3048_s11 }
 0x1af   : > { %2822 = vmatprep.mubr.msk.bf16.mxu1 %vm1069_vm6, %v1088_v45  ;;  %1991 = vrot.lane.b32.xlu0 %v3037_v52, %s3048_s11 }
 0x1b0   : > { %v899_v6 = vpop.permute.xlu0 %898  ;;  %v945_v33 = vpop.permute.xlu1 %944 }
 0x1b1   : > { %v1028_v22 = vsel %vm1020_vm10, %v980_v18, %v945_v33  ;;  %v1089_v27 = vld [vmem:[#allocation2 + $0x8] sm:$0xff]  ;;  %v983_v24 = vsel %vm400_vm1, %v796_v10, %v899_v6  ;;  %v3651_v10 = vld [vmem:[%s3836_s4] ss:$0 sm:$0xff] }
 0x1b2   : > { %1072 = vst.msk [vmem:[#allocation2 + $0x18] sm:$0xff] %vm1069_vm6, %v1028_v22  ;;  %2788 = vmatprep.mubr.msk.bf16.mxu0 %vm1069_vm6, %v1089_v27 }
 0x1b3   : > { %1995 = vrot.lane.b32.xlu0 %v3039_v37, %s3048_s11 }
 0x1b4   : > { %v947_v55 = vpop.permute.xlu0 %946  ;;  %v901_v28 = vpop.permute.xlu1 %900 }
 0x1b5   : > { %v1031_v46 = vsel %vm1020_vm10, %v983_v24, %v947_v55  ;;  %v3532_v56 = vld [vmem:[#allocation2 + $0x10] sm:$0xff]  ;;  %v986_v43 = vsel %vm400_vm1, %v797_v7, %v901_v28 }
 0x1b6   : > { %1073 = vst.msk [vmem:[#allocation2 + $0x20] sm:$0xff] %vm1069_vm6, %v1031_v46  ;;  %2789 = vmatmul.mubr.msk.bf16.vlgmr.msra.gmra.mrb[32].mxu0 %vm1069_vm6, %v3532_v56  ;;  %2823 = vmatmul.mubr.msk.bf16.vlgmr.msra.gmra.mrb[16].mxu1 %vm1069_vm6, %v1089_v27 }
 0x1b7   : > { %2855 = vmatpush3.bf16.msra.mxu1 %v1573_v4  ;;  %2826 = vmatprep.mubr.msk.bf16.mxu1 %vm1069_vm6, %v3532_v56 }
 0x1b8   : > { %v903_v17 = vpop.permute.xlu0 %902  ;;  %v949_v0 = vpop.permute.xlu1 %948 }
 0x1b9   : > { %v1034_v14 = vsel %vm1020_vm10, %v986_v43, %v949_v0  ;;  %v1091_v13 = vld [vmem:[#allocation2 + $0x18] sm:$0xff]  ;;  %v989_v23 = vsel %vm400_vm1, %v798_v35, %v903_v17 }
 0x1ba   : > { %1074 = vst.msk [vmem:[#allocation2 + $0x28] sm:$0xff] %vm1069_vm6, %v1034_v14  ;;  %2792 = vmatprep.mubr.msk.bf16.mxu0 %vm1069_vm6, %v1091_v13 }
 0x1bc   : > { %v951_v39 = vpop.permute.xlu0 %950  ;;  %v905_v32 = vpop.permute.xlu1 %904 }
 0x1bd   : > { %v1037_v59 = vsel %vm1020_vm10, %v989_v23, %v951_v39  ;;  %v1092_v2 = vld [vmem:[#allocation2 + $0x20] sm:$0xff]  ;;  %v992_v61 = vsel %vm400_vm1, %v799_v30, %v905_v32 }
 0x1be   : > { %1075 = vst.msk [vmem:[#allocation2 + $0x30] sm:$0xff] %vm1069_vm6, %v1037_v59  ;;  %2793 = vmatmul.mubr.msk.bf16.gmra.mrb[36].mxu0 %vm1069_vm6, %v1092_v2  ;;  %2827 = vmatmul.mubr.msk.bf16.gmra.mrb[20].mxu1 %vm1069_vm6, %v1091_v13 }
 0x1bf   : > { %2830 = vmatprep.mubr.msk.bf16.mxu1 %vm1069_vm6, %v1092_v2 }
 0x1c0   : > { %v953_v62 = vpop.permute.xlu1 %952  ;;  %v907_v53 = vpop.permute.xlu0 %906 }
 0x1c1   : > { %v1040_v25 = vsel %vm1020_vm10, %v992_v61, %v953_v62  ;;  %v1093_v12 = vld [vmem:[#allocation2 + $0x28] sm:$0xff]  ;;  %v995_v21 = vsel %vm400_vm1, %v800_v5, %v907_v53 }
 0x1c2   : > { %1076 = vst.msk [vmem:[#allocation2 + $0x38] sm:$0xff] %vm1069_vm6, %v1040_v25  ;;  %2796 = vmatprep.mubr.msk.bf16.mxu0 %vm1069_vm6, %v1093_v12 }
 0x1c4   : > { %v955_v9 = vpop.permute.xlu1 %954 }
 0x1c5   : > { %v1043_v16 = vsel %vm1020_vm10, %v995_v21, %v955_v9  ;;  %v1094_v11 = vld [vmem:[#allocation2 + $0x30] sm:$0xff] }
 0x1c6   : > { %1077 = vst.msk [vmem:[#allocation2 + $0x40] sm:$0xff] %vm1069_vm6, %v1043_v16  ;;  %2797 = vmatmul.mubr.msk.bf16.gmra.mrb[40].mxu0 %vm1069_vm6, %v1094_v11  ;;  %2831 = vmatmul.mubr.msk.bf16.gmra.mrb[24].mxu1 %vm1069_vm6, %v1093_v12 }
 0x1c7   : > { %2834 = vmatprep.mubr.msk.bf16.mxu1 %vm1069_vm6, %v1094_v11 }
 0x1c9   : > { %v1095_v38 = vld [vmem:[#allocation2 + $0x38] sm:$0xff] }
 0x1ca   : > { %2800 = vmatprep.mubr.msk.bf16.mxu0 %vm1069_vm6, %v1095_v38 }
 0x1cd   : > { %v1096_v1 = vld [vmem:[#allocation2 + $0x40] sm:$0xff] }
 0x1ce   : > { %2801 = vmatmul.mubr.msk.bf16.gmra.mrb[44].mxu0 %vm1069_vm6, %v1096_v1  ;;  %2835 = vmatmul.mubr.msk.bf16.gmra.mrb[28].mxu1 %vm1069_vm6, %v1095_v38 }
 0x1cf   : > { %2838 = vmatprep.mubr.msk.bf16.mxu1 %vm1069_vm6, %v1096_v1 }
 0x1d6   : > { %2839 = vmatmul.mubr.msk.bf16.gmra.mrb[0].mxu1 %vm1069_vm6, %v3423_v34 }
 0x1d7   : > { %2842 = vmatprep.mubr.msk.bf16.mxu1 %vm1069_vm6, %v3440_v47 }
 0x1de   : > { %2843 = vmatmul.mubr.msk.bf16.gmra.mrb[4].mxu1 %vm1069_vm6, %v3452_v44 }
 0x1df   : > { %2846 = vmatprep.mubr.msk.bf16.mxu1 %vm1069_vm6, %v3462_v40 }
 0x1e6   : > { %2847 = vmatmul.mubr.msk.bf16.gmra.mrb[8].mxu1 %vm1069_vm6, %v3472_v54 }
 0x1e7   : > { %2850 = vmatprep.mubr.msk.bf16.mxu1 %vm1069_vm6, %v3482_v20 }
 0x1ee   : > { %2851 = vmatmul.mubr.msk.bf16.gmra.mrb[12].mxu1 %vm1069_vm6, %v3492_v48 }
 0x1ef   : > { %2856 = vmatprep.mubr.msk.bf16.mxu1 %vm1069_vm6, %v3532_v56 }
 0x1f6   : > { %2857 = vmatmul.mubr.msk.bf16.vlgmr.msra.gmra.mrb[16].mxu1 %vm1069_vm6, %v1091_v13 }
 0x1f7   : > { %2860 = vmatprep.mubr.msk.bf16.mxu1 %vm1069_vm6, %v1092_v2 }
 0x1f9   : > { %v1970_v59 = vpop.permute.xlu1 %1969 }
 0x1fe   : > { %2861 = vmatmul.mubr.msk.bf16.gmra.mrb[20].mxu1 %vm1069_vm6, %v1093_v12 }
 0x1ff   : > { %2864 = vmatprep.mubr.msk.bf16.mxu1 %vm1069_vm6, %v1094_v11 }
 0x200   : > { %v1968_v32 = vpop.permute.xlu0 %1967 }
 0x204   : > { %v1972_v57 = vpop.permute.xlu0 %1971 }
 0x206   : > { %2865 = vmatmul.mubr.msk.bf16.gmra.mrb[24].mxu1 %vm1069_vm6, %v1095_v38 }
 0x207   : > { %2868 = vmatprep.mubr.msk.bf16.mxu1 %vm1069_vm6, %v1096_v1 }
 0x20e   : > { %2869 = vmatmul.mubr.msk.bf16.gmra.mrb[28].mxu1 %vm1069_vm6, %v3423_v34  ;;  %v2047_v34 = vld [vmem:[%s3837_s5] sm:$0xf] }
 0x20f   : > { %2872 = vmatprep.mubr.msk.bf16.mxu1 %vm1069_vm6, %v3440_v47  ;;  %2993 = vmatprep.subr.msk.bf16.mxu0 %vm2087_vm11, %v2047_v34  ;;  %v2089_v47 = vsel %vm2087_vm11, %v2047_v34, 0 }
 0x210   : > { %2889 = vmatpush3.bf16.msra.mxu0 %v2089_v47  ;;  %v1974_v47 = vpop.permute.xlu1 %1973 }
 0x216   : > { %2873 = vmatmul.mubr.msk.bf16.gmra.mrb[0].mxu1 %vm1069_vm6, %v3452_v44  ;;  %v1515_v44 = vld [vmem:[#allocation2 + $0x88] sm:$0xff] }
 0x217   : > { %2876 = vmatprep.mubr.msk.bf16.mxu1 %vm1069_vm6, %v3462_v40 }
 0x21e   : > { %2877 = vmatmul.mubr.msk.bf16.gmra.mrb[4].mxu1 %vm1069_vm6, %v3472_v54 }
 0x21f   : > { %2880 = vmatprep.mubr.msk.bf16.mxu1 %vm1069_vm6, %v3482_v20 }
 0x226   : > { %2881 = vmatmul.mubr.msk.bf16.gmra.mrb[8].mxu1 %vm1069_vm6, %v3492_v48 }
 0x227   : > { %2884 = vmatprep.mubr.msk.bf16.mxu1 %vm1069_vm6, %v3502_v3 }
 0x22e   : > { %2885 = vmatmul.mubr.msk.bf16.gmra.mrb[12].mxu1 %vm1069_vm6, %v1515_v44 }
 0x289   : > { %v2790_v40 = vpop.f32.mrb[32].mxu0 }
 0x28a   : > { %v1201_v54 = vpop.f32.mrb[33].mxu0 }
 0x28b   : > { %v2791_v20 = vpop.f32.mrb[34].mxu0 }
 0x28c   : > { %v1204_v45 = vpop.f32.mrb[35].mxu0 }
 0x291   : > { %v2794_v29 = vpop.f32.mrb[36].mxu0 }
 0x292   : > { %v1217_v15 = vpop.f32.mrb[37].mxu0 }
 0x293   : > { %v2795_v19 = vpop.f32.mrb[38].mxu0 }
 0x294   : > { %v1220_v49 = vpop.f32.mrb[39].mxu0 }
 0x299   : > { %v2798_v18 = vpop.f32.mrb[40].mxu0 }
 0x29a   : > { %v1233_v6 = vpop.f32.mrb[41].mxu0 }
 0x29b   : > { %v2799_v33 = vpop.f32.mrb[42].mxu0 }
 0x29c   : > { %v1236_v60 = vpop.f32.mrb[43].mxu0 }
 0x2a1   : > { %v3640_v48 = vpop.f32.mrb[44].mxu0 }
 0x2a2   : > { %v3642_v26 = vpop.f32.mrb[45].mxu0 }
 0x2a3   : > { %v3644_v3 = vpop.f32.mrb[46].mxu0 }
 0x2a4   : > { %v3646_v22 = vpop.f32.mrb[47].mxu0 }
 0x2c9   : > { %v2858_v27 = vpop.f32.mrb[16].mxu1 }
 0x2ca   : > { %v2924_v24 = vadd.f32 %v2858_v27, %v2790_v40  ;;  %v1609_v55 = vpop.f32.mrb[17].mxu1 }
 0x2cb   : > { %v2925_v28 = vadd.f32 %v1609_v55, %v1201_v54  ;;  %v2859_v4 = vpop.f32.mrb[18].mxu1 }
 0x2cc   : > { %v1777_v41 = vadd.f32 %v2924_v24, %v3651_v10  ;;  %v2926_v8 = vadd.f32 %v2859_v4, %v2791_v20  ;;  %v1612_v46 = vpop.f32.mrb[19].mxu1 }
 0x2cd   : > { %v1775_v56 = vadd.f32 %v2925_v28, %v3651_v10  ;;  %v2927_v7 = vadd.f32 %v1612_v46, %v1204_v45 }
 0x2ce   : > { %v1778_v43 = vadd.f32 %v2926_v8, %v3651_v10  ;;  %v1809_v0 = vmax.f32 %v1777_v41, 0.0 }
 0x2cf   : > { %v1776_v17 = vadd.f32 %v2927_v7, %v3651_v10  ;;  %v1807_v63 = vmax.f32 %v1775_v56, 0.0  ;;  %v1978_v56 = vpop.permute.xlu1 %1977 }
 0x2d0   : > { %v1810_v51 = vmax.f32 %v1778_v43, 0.0 }
 0x2d1   : > { %v1808_v14 = vmax.f32 %v1776_v17, 0.0  ;;  %v2862_v13 = vpop.f32.mrb[20].mxu1 }
 0x2d2   : > { %v1840_v35 = vpack.c.bf16 %v1810_v51, %v1809_v0  ;;  %v2928_v23 = vadd.f32 %v2862_v13, %v2794_v29  ;;  %v1625_v39 = vpop.f32.mrb[21].mxu1 }
 0x2d3   : > { %v1839_v36 = vpack.c.bf16 %v1808_v14, %v1807_v63  ;;  %v2929_v31 = vadd.f32 %v1625_v39, %v1217_v15  ;;  %v2863_v2 = vpop.f32.mrb[22].mxu1 }
 0x2d4   : > { %v1781_v30 = vadd.f32 %v2928_v23, %v3651_v10  ;;  %v2930_v61 = vadd.f32 %v2863_v2, %v2795_v19  ;;  %v1628_v62 = vpop.f32.mrb[23].mxu1  ;;  %v2004_v25 = vsel %vm400_vm1, %v1840_v35, %v1970_v59 }
 0x2d5   : > { %v1779_v58 = vadd.f32 %v2929_v31, %v3651_v10  ;;  %v2001_v42 = vsel %vm400_vm1, %v1839_v36, %v1968_v32  ;;  %v2931_v53 = vadd.f32 %v1628_v62, %v1220_v49 }
 0x2d6   : > { %v1782_v12 = vadd.f32 %v2930_v61, %v3651_v10  ;;  %2890 = vmatprep.mubr.msk.bf16.mxu0 %vm1020_vm10, %v2001_v42  ;;  %v1813_v21 = vmax.f32 %v1781_v30, 0.0  ;;  %v1982_v61 = vpop.permute.xlu1 %1981 }
 0x2d7   : > { %v1780_v5 = vadd.f32 %v2931_v53, %v3651_v10  ;;  %2891 = vmatmul.mubr.msk.bf16.vlgmr.msra.gmra.mrb[48].mxu0 %vm1020_vm10, %v2004_v25  ;;  %v1811_v16 = vmax.f32 %v1779_v58, 0.0 }
 0x2d8   : > { %v1814_v9 = vmax.f32 %v1782_v12, 0.0 }
 0x2d9   : > { %v1812_v11 = vmax.f32 %v1780_v5, 0.0  ;;  %v2866_v38 = vpop.f32.mrb[24].mxu1 }
 0x2da   : > { %v1842_v1 = vpack.c.bf16 %v1814_v9, %v1813_v21  ;;  %v2932_v50 = vadd.f32 %v2866_v38, %v2798_v18  ;;  %v1641_v52 = vpop.f32.mrb[25].mxu1 }
 0x2db   : > { %v1841_v37 = vpack.c.bf16 %v1812_v11, %v1811_v16  ;;  %v2933_v34 = vadd.f32 %v1641_v52, %v1233_v6  ;;  %v2867_v44 = vpop.f32.mrb[26].mxu1 }
 0x2dc   : > { %v1785_v40 = vadd.f32 %v2932_v50, %v3651_v10  ;;  %v2934_v54 = vadd.f32 %v2867_v44, %v2799_v33  ;;  %v1644_v20 = vpop.f32.mrb[27].mxu1  ;;  %v2010_v19 = vsel %vm400_vm1, %v1842_v1, %v1974_v47 }
 0x2dd   : > { %v1783_v45 = vadd.f32 %v2933_v34, %v3651_v10  ;;  %v2007_v29 = vsel %vm400_vm1, %v1841_v37, %v1972_v57  ;;  %v2935_v15 = vadd.f32 %v1644_v20, %v1236_v60  ;;  %v1976_v60 = vpop.permute.xlu0 %1975  ;;  %v1986_v37 = vpop.permute.xlu1 %1985 }
 0x2de   : > { %v1786_v49 = vadd.f32 %v2934_v54, %v3651_v10  ;;  %2894 = vmatprep.mubr.msk.bf16.mxu0 %vm1020_vm10, %v2007_v29  ;;  %v1817_v6 = vmax.f32 %v1785_v40, 0.0 }
 0x2df   : > { %v1784_v18 = vadd.f32 %v2935_v15, %v3651_v10  ;;  %2895 = vmatmul.mubr.msk.bf16.gmra.mrb[52].mxu0 %vm1020_vm10, %v2010_v19  ;;  %v1815_v24 = vmax.f32 %v1783_v45, 0.0 }
 0x2e0   : > { %v1818_v27 = vmax.f32 %v1786_v49, 0.0 }
 0x2e1   : > { %v1816_v33 = vmax.f32 %v1784_v18, 0.0  ;;  %v2870_v55 = vpop.f32.mrb[28].mxu1 }
 0x2e2   : > { %v1844_v28 = vpack.c.bf16 %v1818_v27, %v1817_v6  ;;  %v2936_v4 = vadd.f32 %v2870_v55, %v3640_v48  ;;  %v1657_v41 = vpop.f32.mrb[29].mxu1 }
 0x2e3   : > { %v1843_v8 = vpack.c.bf16 %v1816_v33, %v1815_v24  ;;  %v2937_v46 = vadd.f32 %v1657_v41, %v3642_v26  ;;  %v2871_v7 = vpop.f32.mrb[30].mxu1 }
 0x2e4   : > { %v1789_v43 = vadd.f32 %v2936_v4, %v3651_v10  ;;  %v2938_v17 = vadd.f32 %v2871_v7, %v3644_v3  ;;  %v1660_v0 = vpop.f32.mrb[31].mxu1  ;;  %v2016_v48 = vsel %vm400_vm1, %v1844_v28, %v1978_v56  ;;  %v1990_v28 = vpop.permute.xlu1 %1989 }
 0x2e5   : > { %v1787_v51 = vadd.f32 %v2937_v46, %v3651_v10  ;;  %v2013_v63 = vsel %vm400_vm1, %v1843_v8, %v1976_v60  ;;  %v2939_v14 = vadd.f32 %v1660_v0, %v3646_v22  ;;  %v1980_v22 = vpop.permute.xlu0 %1979 }
 0x2e6   : > { %v1790_v13 = vadd.f32 %v2938_v17, %v3651_v10  ;;  %2898 = vmatprep.mubr.msk.bf16.mxu0 %vm1020_vm10, %v2013_v63  ;;  %v1821_v35 = vmax.f32 %v1789_v43, 0.0 }
 0x2e7   : > { %v1788_v26 = vadd.f32 %v2939_v14, %v3651_v10  ;;  %2899 = vmatmul.mubr.msk.bf16.gmra.mrb[56].mxu0 %vm1020_vm10, %v2016_v48  ;;  %v1819_v3 = vmax.f32 %v1787_v51, 0.0 }
 0x2e8   : > { %v1822_v23 = vmax.f32 %v1790_v13, 0.0 }
 0x2e9   : > { %v1820_v39 = vmax.f32 %v1788_v26, 0.0  ;;  %v2874_v32 = vpop.f32.mrb[0].mxu1  ;;  %v1984_v38 = vpop.permute.xlu0 %1983 }
 0x2ea   : > { %v1846_v36 = vpack.c.bf16 %v1822_v23, %v1821_v35  ;;  %v1793_v31 = vadd.f32 %v2874_v32, %v3651_v10  ;;  %v1673_v59 = vpop.f32.mrb[1].mxu1  ;;  %v1994_v23 = vpop.permute.xlu1 %1993 }
 0x2eb   : > { %v1845_v2 = vpack.c.bf16 %v1820_v39, %v1819_v3  ;;  %v1791_v30 = vadd.f32 %v3651_v10, %v1673_v59  ;;  %v2875_v62 = vpop.f32.mrb[2].mxu1 }
 0x2ec   : > { %v1794_v58 = vadd.f32 %v2875_v62, %v3651_v10  ;;  %v1676_v42 = vpop.f32.mrb[3].mxu1  ;;  %v1825_v12 = vmax.f32 %v1793_v31, 0.0  ;;  %v2022_v5 = vsel %vm400_vm1, %v1846_v36, %v1982_v61 }
 0x2ed   : > { %v2019_v53 = vsel %vm400_vm1, %v1845_v2, %v1980_v22  ;;  %v1792_v25 = vadd.f32 %v3651_v10, %v1676_v42  ;;  %v1823_v9 = vmax.f32 %v1791_v30, 0.0  ;;  %v1988_v6 = vpop.permute.xlu0 %1987 }
 0x2ee   : > { %v1826_v21 = vmax.f32 %v1794_v58, 0.0  ;;  %2902 = vmatprep.mubr.msk.bf16.mxu0 %vm1020_vm10, %v2019_v53 }
 0x2ef   : > { %v1824_v16 = vmax.f32 %v1792_v25, 0.0  ;;  %2903 = vmatmul.mubr.msk.bf16.gmra.mrb[60].mxu0 %vm1020_vm10, %v2022_v5  ;;  %v1998_v25 = vpop.permute.xlu1 %1997 }
 0x2f0   : > { %v1848_v11 = vpack.c.bf16 %v1826_v21, %v1825_v12 }
 0x2f1   : > { %v1847_v1 = vpack.c.bf16 %v1824_v16, %v1823_v9  ;;  %v2878_v50 = vpop.f32.mrb[4].mxu1  ;;  %v1992_v14 = vpop.permute.xlu0 %1991 }
 0x2f2   : > { %v1797_v52 = vadd.f32 %v2878_v50, %v3651_v10  ;;  %v1689_v57 = vpop.f32.mrb[5].mxu1  ;;  %v2028_v45 = vsel %vm400_vm1, %v1848_v11, %v1986_v37 }
 0x2f3   : > { %v2025_v34 = vsel %vm400_vm1, %v1847_v1, %v1984_v38  ;;  %v1795_v47 = vadd.f32 %v3651_v10, %v1689_v57  ;;  %v2879_v44 = vpop.f32.mrb[6].mxu1 }
 0x2f4   : > { %v1798_v40 = vadd.f32 %v2879_v44, %v3651_v10  ;;  %v1692_v54 = vpop.f32.mrb[7].mxu1  ;;  %2906 = vmatprep.mubr.msk.bf16.mxu0 %vm1020_vm10, %v2025_v34  ;;  %v1829_v29 = vmax.f32 %v1797_v52, 0.0 }
 0x2f5   : > { %v1796_v20 = vadd.f32 %v3651_v10, %v1692_v54  ;;  %v1827_v19 = vmax.f32 %v1795_v47, 0.0  ;;  %v1996_v42 = vpop.permute.xlu0 %1995 }
 0x2f6   : > { %v1830_v15 = vmax.f32 %v1798_v40, 0.0 }
 0x2f7   : > { %v1828_v49 = vmax.f32 %v1796_v20, 0.0  ;;  %2907 = vmatmul.mubr.msk.bf16.gmra.mrb[64].mxu0 %vm1020_vm10, %v2028_v45 }
 0x2f8   : > { %v1850_v18 = vpack.c.bf16 %v1830_v15, %v1829_v29 }
 0x2f9   : > { %v1849_v27 = vpack.c.bf16 %v1828_v49, %v1827_v19  ;;  %v2882_v24 = vpop.f32.mrb[8].mxu1 }
 0x2fa   : > { %v1801_v33 = vadd.f32 %v2882_v24, %v3651_v10  ;;  %v1705_v55 = vpop.f32.mrb[9].mxu1  ;;  %v2034_v7 = vsel %vm400_vm1, %v1850_v18, %v1990_v28 }
 0x2fb   : > { %v2031_v4 = vsel %vm400_vm1, %v1849_v27, %v1988_v6  ;;  %v1799_v41 = vadd.f32 %v3651_v10, %v1705_v55  ;;  %v2883_v60 = vpop.f32.mrb[10].mxu1 }
 0x2fc   : > { %v1802_v8 = vadd.f32 %v2883_v60, %v3651_v10  ;;  %v1708_v46 = vpop.f32.mrb[11].mxu1  ;;  %2910 = vmatprep.mubr.msk.bf16.mxu0 %vm1020_vm10, %v2031_v4  ;;  %v1833_v43 = vmax.f32 %v1801_v33, 0.0 }
 0x2fd   : > { %v1800_v56 = vadd.f32 %v3651_v10, %v1708_v46  ;;  %v1831_v0 = vmax.f32 %v1799_v41, 0.0 }
 0x2fe   : > { %v1834_v17 = vmax.f32 %v1802_v8, 0.0 }
 0x2ff   : > { %v1832_v51 = vmax.f32 %v1800_v56, 0.0  ;;  %2911 = vmatmul.mubr.msk.bf16.gmra.mrb[68].mxu0 %vm1020_vm10, %v2034_v7 }
 0x300   : > { %v1852_v63 = vpack.c.bf16 %v1834_v17, %v1833_v43 }
 0x301   : > { %v1851_v48 = vpack.c.bf16 %v1832_v51, %v1831_v0  ;;  %v2886_v13 = vpop.f32.mrb[12].mxu1 }
 0x302   : > { %v1805_v26 = vadd.f32 %v2886_v13, %v3651_v10  ;;  %v1721_v35 = vpop.f32.mrb[13].mxu1  ;;  %v2040_v22 = vsel %vm400_vm1, %v1852_v63, %v1994_v23 }
 0x303   : > { %v2037_v3 = vsel %vm400_vm1, %v1851_v48, %v1992_v14  ;;  %v1803_v39 = vadd.f32 %v3651_v10, %v1721_v35  ;;  %v2887_v32 = vpop.f32.mrb[14].mxu1 }
 0x304   : > { %v1806_v36 = vadd.f32 %v2887_v32, %v3651_v10  ;;  %v1724_v31 = vpop.f32.mrb[15].mxu1  ;;  %2914 = vmatprep.mubr.msk.bf16.mxu0 %vm1020_vm10, %v2037_v3  ;;  %v1837_v2 = vmax.f32 %v1805_v26, 0.0 }
 0x305   : > { %v1804_v59 = vadd.f32 %v3651_v10, %v1724_v31  ;;  %v1835_v61 = vmax.f32 %v1803_v39, 0.0  ;;  %v3724_v10 = vld [vmem:[%s3838_s6] ss:$0 sm:$0xff] }
 0x306   : > { %v1838_v30 = vmax.f32 %v1806_v36, 0.0 }
 0x307   : > { %v1836_v62 = vmax.f32 %v1804_v59, 0.0  ;;  %2915 = vmatmul.mubr.msk.bf16.gmra.mrb[72].mxu0 %vm1020_vm10, %v2040_v22 }
 0x308   : > { %v1854_v58 = vpack.c.bf16 %v1838_v30, %v1837_v2 }
 0x309   : > { %v1853_v53 = vpack.c.bf16 %v1836_v62, %v1835_v61 }
 0x30a   : > { %v2046_v5 = vsel %vm400_vm1, %v1854_v58, %v1998_v25 }
 0x30b   : > { %v2043_v12 = vsel %vm400_vm1, %v1853_v53, %v1996_v42 }
 0x30c   : > { %2918 = vmatprep.mubr.msk.bf16.mxu0 %vm1020_vm10, %v2043_v12 }
 0x30f   : > { %2919 = vmatmul.mubr.msk.bf16.gmra.mrb[76].mxu0 %vm1020_vm10, %v2046_v5 }
 0x3aa   : > { %v2892_v21 = vpop.f32.mrb[48].mxu0 }
 0x3ab   : > { %v2134_v9 = vadd.f32 %v2892_v21, %v3724_v10  ;;  %v2125_v16 = vpop.f32.mrb[49].mxu0 }
 0x3ac   : > { %v2126_v11 = vadd.f32 %v3724_v10, %v2125_v16  ;;  %v2893_v38 = vpop.f32.mrb[50].mxu0 }
 0x3ad   : > { %v2637_v1 = vpack.c.bf16 %v2134_v9, %v2134_v9  ;;  %v2137_v50 = vadd.f32 %v2893_v38, %v3724_v10  ;;  %v2128_v52 = vpop.f32.mrb[51].mxu0 }
 0x3ae   : > { %v2635_v57 = vpack.c.bf16 %v2126_v11, %v2126_v11  ;;  %v2129_v37 = vadd.f32 %v3724_v10, %v2128_v52 }
 0x3af   : > { %2383 = vst.msk [vmem:[%s3732_s30 + $0x8] sm:$0xf] %vm2380_vm12, %v2637_v1  ;;  %v2638_v34 = vpack.c.bf16 %v2137_v50, %v2137_v50 }
 0x3b0   : > { %2381 = vst.msk [vmem:[%s3732_s30] sm:$0xf] %vm2380_vm12, %v2635_v57  ;;  %v2636_v47 = vpack.c.bf16 %v2129_v37, %v2129_v37 }
 0x3b1   : > { %2384 = vst.msk [vmem:[%s3732_s30 + $0xc] sm:$0xf] %vm2380_vm12, %v2638_v34 }
 0x3b2   : > { %2382 = vst.msk [vmem:[%s3732_s30 + $0x4] sm:$0xf] %vm2380_vm12, %v2636_v47  ;;  %v2896_v44 = vpop.f32.mrb[52].mxu0 }
 0x3b3   : > { %v2150_v40 = vadd.f32 %v2896_v44, %v3724_v10  ;;  %v2141_v54 = vpop.f32.mrb[53].mxu0 }
 0x3b4   : > { %v2142_v20 = vadd.f32 %v3724_v10, %v2141_v54  ;;  %v2897_v45 = vpop.f32.mrb[54].mxu0 }
 0x3b5   : > { %v2641_v29 = vpack.c.bf16 %v2150_v40, %v2150_v40  ;;  %v2153_v15 = vadd.f32 %v2897_v45, %v3724_v10  ;;  %v2144_v19 = vpop.f32.mrb[55].mxu0 }
 0x3b6   : > { %v2639_v49 = vpack.c.bf16 %v2142_v20, %v2142_v20  ;;  %v2145_v18 = vadd.f32 %v3724_v10, %v2144_v19 }
 0x3b7   : > { %2387 = vst.msk [vmem:[%s3732_s30 + $0x18] sm:$0xf] %vm2380_vm12, %v2641_v29  ;;  %v2642_v6 = vpack.c.bf16 %v2153_v15, %v2153_v15 }
 0x3b8   : > { %2385 = vst.msk [vmem:[%s3732_s30 + $0x10] sm:$0xf] %vm2380_vm12, %v2639_v49  ;;  %v2640_v27 = vpack.c.bf16 %v2145_v18, %v2145_v18 }
 0x3b9   : > { %2388 = vst.msk [vmem:[%s3732_s30 + $0x1c] sm:$0xf] %vm2380_vm12, %v2642_v6 }
 0x3ba   : > { %2386 = vst.msk [vmem:[%s3732_s30 + $0x14] sm:$0xf] %vm2380_vm12, %v2640_v27  ;;  %v2900_v24 = vpop.f32.mrb[56].mxu0 }
 0x3bb   : > { %v2166_v33 = vadd.f32 %v2900_v24, %v3724_v10  ;;  %v2157_v55 = vpop.f32.mrb[57].mxu0 }
 0x3bc   : > { %v2158_v28 = vadd.f32 %v3724_v10, %v2157_v55  ;;  %v2901_v4 = vpop.f32.mrb[58].mxu0 }
 0x3bd   : > { %v2645_v41 = vpack.c.bf16 %v2166_v33, %v2166_v33  ;;  %v2169_v60 = vadd.f32 %v2901_v4, %v3724_v10  ;;  %v2160_v8 = vpop.f32.mrb[59].mxu0 }
 0x3be   : > { %v2643_v46 = vpack.c.bf16 %v2158_v28, %v2158_v28  ;;  %v2161_v56 = vadd.f32 %v3724_v10, %v2160_v8 }
 0x3bf   : > { %2391 = vst.msk [vmem:[%s3732_s30 + $0x28] sm:$0xf] %vm2380_vm12, %v2645_v41  ;;  %v2646_v7 = vpack.c.bf16 %v2169_v60, %v2169_v60 }
 0x3c0   : > { %2389 = vst.msk [vmem:[%s3732_s30 + $0x20] sm:$0xf] %vm2380_vm12, %v2643_v46  ;;  %v2644_v43 = vpack.c.bf16 %v2161_v56, %v2161_v56 }
 0x3c1   : > { %2392 = vst.msk [vmem:[%s3732_s30 + $0x2c] sm:$0xf] %vm2380_vm12, %v2646_v7 }
 0x3c2   : > { %2390 = vst.msk [vmem:[%s3732_s30 + $0x24] sm:$0xf] %vm2380_vm12, %v2644_v43  ;;  %v2904_v17 = vpop.f32.mrb[60].mxu0 }
 0x3c3   : > { %v2182_v0 = vadd.f32 %v2904_v17, %v3724_v10  ;;  %v2173_v51 = vpop.f32.mrb[61].mxu0 }
 0x3c4   : > { %v2174_v63 = vadd.f32 %v3724_v10, %v2173_v51  ;;  %v2905_v14 = vpop.f32.mrb[62].mxu0 }
 0x3c5   : > { %v2649_v48 = vpack.c.bf16 %v2182_v0, %v2182_v0  ;;  %v2185_v13 = vadd.f32 %v2905_v14, %v3724_v10  ;;  %v2176_v26 = vpop.f32.mrb[63].mxu0 }
 0x3c6   : > { %v2647_v35 = vpack.c.bf16 %v2174_v63, %v2174_v63  ;;  %v2177_v23 = vadd.f32 %v3724_v10, %v2176_v26 }
 0x3c7   : > { %2395 = vst.msk [vmem:[%s3732_s30 + $0x38] sm:$0xf] %vm2380_vm12, %v2649_v48  ;;  %v2650_v3 = vpack.c.bf16 %v2185_v13, %v2185_v13 }
 0x3c8   : > { %2393 = vst.msk [vmem:[%s3732_s30 + $0x30] sm:$0xf] %vm2380_vm12, %v2647_v35  ;;  %v2648_v39 = vpack.c.bf16 %v2177_v23, %v2177_v23 }
 0x3c9   : > { %2396 = vst.msk [vmem:[%s3732_s30 + $0x3c] sm:$0xf] %vm2380_vm12, %v2650_v3 }
 0x3ca   : > { %2394 = vst.msk [vmem:[%s3732_s30 + $0x34] sm:$0xf] %vm2380_vm12, %v2648_v39  ;;  %v2908_v32 = vpop.f32.mrb[64].mxu0 }
 0x3cb   : > { %v2198_v36 = vadd.f32 %v2908_v32, %v3724_v10  ;;  %v2189_v31 = vpop.f32.mrb[65].mxu0 }
 0x3cc   : > { %v2190_v59 = vadd.f32 %v3724_v10, %v2189_v31  ;;  %v2909_v22 = vpop.f32.mrb[66].mxu0 }
 0x3cd   : > { %v2653_v2 = vpack.c.bf16 %v2198_v36, %v2198_v36  ;;  %v2201_v30 = vadd.f32 %v2909_v22, %v3724_v10  ;;  %v2192_v61 = vpop.f32.mrb[67].mxu0 }
 0x3ce   : > { %v2651_v62 = vpack.c.bf16 %v2190_v59, %v2190_v59  ;;  %v2193_v58 = vadd.f32 %v3724_v10, %v2192_v61 }
 0x3cf   : > { %2399 = vst.msk [vmem:[%s3732_s30 + $0x48] sm:$0xf] %vm2380_vm12, %v2653_v2  ;;  %v2654_v42 = vpack.c.bf16 %v2201_v30, %v2201_v30 }
 0x3d0   : > { %2397 = vst.msk [vmem:[%s3732_s30 + $0x40] sm:$0xf] %vm2380_vm12, %v2651_v62  ;;  %v2652_v53 = vpack.c.bf16 %v2193_v58, %v2193_v58 }
 0x3d1   : > { %2400 = vst.msk [vmem:[%s3732_s30 + $0x4c] sm:$0xf] %vm2380_vm12, %v2654_v42 }
 0x3d2   : > { %2398 = vst.msk [vmem:[%s3732_s30 + $0x44] sm:$0xf] %vm2380_vm12, %v2652_v53  ;;  %v2912_v25 = vpop.f32.mrb[68].mxu0 }
 0x3d3   : > { %v2214_v12 = vadd.f32 %v2912_v25, %v3724_v10  ;;  %v2205_v5 = vpop.f32.mrb[69].mxu0 }
 0x3d4   : > { %v2206_v21 = vadd.f32 %v3724_v10, %v2205_v5  ;;  %v2913_v9 = vpop.f32.mrb[70].mxu0 }
 0x3d5   : > { %v2657_v16 = vpack.c.bf16 %v2214_v12, %v2214_v12  ;;  %v2217_v11 = vadd.f32 %v2913_v9, %v3724_v10  ;;  %v2208_v38 = vpop.f32.mrb[71].mxu0 }
 0x3d6   : > { %v2655_v1 = vpack.c.bf16 %v2206_v21, %v2206_v21  ;;  %v2209_v50 = vadd.f32 %v3724_v10, %v2208_v38 }
 0x3d7   : > { %2403 = vst.msk [vmem:[%s3732_s30 + $0x58] sm:$0xf] %vm2380_vm12, %v2657_v16  ;;  %v2658_v52 = vpack.c.bf16 %v2217_v11, %v2217_v11 }
 0x3d8   : > { %2401 = vst.msk [vmem:[%s3732_s30 + $0x50] sm:$0xf] %vm2380_vm12, %v2655_v1  ;;  %v2656_v57 = vpack.c.bf16 %v2209_v50, %v2209_v50 }
 0x3d9   : > { %2404 = vst.msk [vmem:[%s3732_s30 + $0x5c] sm:$0xf] %vm2380_vm12, %v2658_v52 }
 0x3da   : > { %2402 = vst.msk [vmem:[%s3732_s30 + $0x54] sm:$0xf] %vm2380_vm12, %v2656_v57  ;;  %v2916_v37 = vpop.f32.mrb[72].mxu0 }
 0x3db   : > { %v2230_v34 = vadd.f32 %v2916_v37, %v3724_v10  ;;  %v2221_v47 = vpop.f32.mrb[73].mxu0 }
 0x3dc   : > { %v2222_v44 = vadd.f32 %v3724_v10, %v2221_v47  ;;  %v2917_v40 = vpop.f32.mrb[74].mxu0 }
 0x3dd   : > { %v2661_v54 = vpack.c.bf16 %v2230_v34, %v2230_v34  ;;  %v2233_v20 = vadd.f32 %v2917_v40, %v3724_v10  ;;  %v2224_v45 = vpop.f32.mrb[75].mxu0 }
 0x3de   : > { %v2659_v29 = vpack.c.bf16 %v2222_v44, %v2222_v44  ;;  %v2225_v15 = vadd.f32 %v3724_v10, %v2224_v45 }
 0x3df   : > { %2407 = vst.msk [vmem:[%s3732_s30 + $0x68] sm:$0xf] %vm2380_vm12, %v2661_v54  ;;  %v2662_v19 = vpack.c.bf16 %v2233_v20, %v2233_v20 }
 0x3e0   : > { %2405 = vst.msk [vmem:[%s3732_s30 + $0x60] sm:$0xf] %vm2380_vm12, %v2659_v29  ;;  %v2660_v49 = vpack.c.bf16 %v2225_v15, %v2225_v15 }
 0x3e1   : > { %2408 = vst.msk [vmem:[%s3732_s30 + $0x6c] sm:$0xf] %vm2380_vm12, %v2662_v19 }
 0x3e2   : > { %2406 = vst.msk [vmem:[%s3732_s30 + $0x64] sm:$0xf] %vm2380_vm12, %v2660_v49  ;;  %v2920_v18 = vpop.f32.mrb[76].mxu0 }
 0x3e3   : > { %v2246_v6 = vadd.f32 %v2920_v18, %v3724_v10  ;;  %v2237_v27 = vpop.f32.mrb[77].mxu0 }
 0x3e4   : > { %v2238_v24 = vadd.f32 %v3724_v10, %v2237_v27  ;;  %v2921_v33 = vpop.f32.mrb[78].mxu0 }
 0x3e5   : > { %v2665_v55 = vpack.c.bf16 %v2246_v6, %v2246_v6  ;;  %v2249_v28 = vadd.f32 %v2921_v33, %v3724_v10  ;;  %v2240_v4 = vpop.f32.mrb[79].mxu0 }
 0x3e6   : > { %v2663_v41 = vpack.c.bf16 %v2238_v24, %v2238_v24  ;;  %v2241_v60 = vadd.f32 %v3724_v10, %v2240_v4 }
 0x3e7   : > { %2411 = vst.msk [vmem:[%s3732_s30 + $0x78] sm:$0xf] %vm2380_vm12, %v2665_v55  ;;  %v2666_v8 = vpack.c.bf16 %v2249_v28, %v2249_v28 }
 0x3e8   : > { %2409 = vst.msk [vmem:[%s3732_s30 + $0x70] sm:$0xf] %vm2380_vm12, %v2663_v41  ;;  %v2664_v46 = vpack.c.bf16 %v2241_v60, %v2241_v60 }
 0x3e9   : > { %2412 = vst.msk [vmem:[%s3732_s30 + $0x7c] sm:$0xf] %vm2380_vm12, %v2666_v8 }
 0x3ea   : > { %2410 = vst.msk [vmem:[%s3732_s30 + $0x74] sm:$0xf] %vm2380_vm12, %v2664_v46 }
 0x3eb PF: > { %s17_s24 = sadd.s32 1, %s3046_s24  }
 0x3ec   : > { %p14_p4 = scmp.ge.s32.totalorder %s17_s24, 4  }
 0x3ee   :  { %16 = sbr.rel (!%p14_p4) target bundleno = 1 (0x1), region = 80 }

</bundles_post_ra>
